<compile_context>
chip_gen: v5e
topology: v5e:2x2
jax: 0.10.0
libtpu: 0.0.40
codegen_flags: <defaults>
</compile_context>

<pallas_src>
import functools

import jax
import jax.numpy as jnp
from jax.experimental import pallas as pl
from jax.experimental.pallas import tpu as pltpu

LN_EPS = 1e-5


def _layernorm(z, w, b):
    mu = jnp.mean(z, axis=-1, keepdims=True)
    var = jnp.mean((z - mu) ** 2, axis=-1, keepdims=True)
    return (z - mu) * jax.lax.rsqrt(var + LN_EPS) * w + b


def perceiver_attention_kernel(
    x_ref,       # (TB, n1, D)        image-feature slabs
    lat_ref,     # (TB, n2, D)        latent slabs
    lnp_ref,     # (4, D) f32         [norm_media_w, norm_media_b, norm_latents_w, norm_latents_b]
    w_lat_ref,   # (D, 3*inner)       [wq*scale | wk | wv], compute dtype (bf16)
    w_x_ref,     # (D, 2*inner)       [wk | wv], compute dtype
    wout_ref,    # (inner, D)         to_out weight, compute dtype
    o_ref,       # (TB, n2, D)        output slabs
    *,
    heads,
    dim_head,
):
    tb, n1, d = x_ref.shape
    _, n2, _ = lat_ref.shape
    inner = heads * dim_head
    mxu_dtype = w_lat_ref.dtype  # bf16 weights => bf16 MXU inputs, f32 accumulation

    # LayerNorm params stay f32; elementwise LN math runs in f32.
    lnp = lnp_ref[...]
    gm_w, gm_b = lnp[0:1], lnp[1:2]
    gl_w, gl_b = lnp[2:3], lnp[3:4]

    # Flatten the TB slabs into one big row dim for LN + projections.
    x2 = x_ref[...].reshape(tb * n1, d).astype(jnp.float32)
    l2 = lat_ref[...].reshape(tb * n2, d).astype(jnp.float32)
    xn = _layernorm(x2, gm_w, gm_b).astype(mxu_dtype)   # (tb*n1, d)
    ln = _layernorm(l2, gl_w, gl_b).astype(mxu_dtype)   # (tb*n2, d)

    # Two wide-N fused projections (q scale already folded into w_lat's q block).
    lat_proj = jnp.dot(ln, w_lat_ref[...], preferred_element_type=jnp.float32)  # (tb*n2, 3*inner)
    x_proj = jnp.dot(xn, w_x_ref[...], preferred_element_type=jnp.float32)      # (tb*n1, 2*inner)

    # 128-aligned lane slices (free when inner % 128 == 0), leading-dim reshapes.
    q3 = lat_proj[:, :inner].reshape(tb, n2, inner).astype(mxu_dtype)
    kl = lat_proj[:, inner:2 * inner].reshape(tb, n2, inner)
    vl = lat_proj[:, 2 * inner:].reshape(tb, n2, inner)
    kx = x_proj[:, :inner].reshape(tb, n1, inner)
    vx = x_proj[:, inner:].reshape(tb, n1, inner)

    # Single K / V over all (n1 + n2) key rows -- sublane concat (n1, n2 mult of 8).
    # Row order [x; latents] matches torch.cat((x, latents), dim=-2).
    k3 = jnp.concatenate([kx, kl], axis=1).astype(mxu_dtype)   # (tb, n1+n2, inner)
    v3 = jnp.concatenate([vx, vl], axis=1).astype(mxu_dtype)   # (tb, n1+n2, inner)

    def bdot_nt(a, b):   # (tb, i, d) x (tb, j, d) -> (tb, i, j), no explicit .T
        return jax.lax.dot_general(
            a, b, (((2,), (2,)), ((0,), (0,))),
            preferred_element_type=jnp.float32)

    def bdot(a, b):      # (tb, i, j) x (tb, j, d) -> (tb, i, d)
        return jax.lax.dot_general(
            a, b, (((2,), (1,)), ((0,), (0,))),
            preferred_element_type=jnp.float32)

    head_outs = []
    for h in range(heads):                      # heads is small & static -> unrolled
        hs = slice(h * dim_head, (h + 1) * dim_head)
        s = bdot_nt(q3[:, :, hs], k3[:, :, hs])                 # (tb, n2, n1+n2) f32
        row_max = jnp.max(s, axis=-1, keepdims=True)
        p = jnp.exp(s - row_max)
        inv = pl.reciprocal(jnp.sum(p, axis=-1, keepdims=True), approx=True)  # EUP
        oh = bdot(p.astype(mxu_dtype), v3[:, :, hs]) * inv      # (tb, n2, dh) f32
        head_outs.append(oh)

    # One lane concat of the head outputs, then a single full-K output projection.
    o_all = jnp.concatenate(head_outs, axis=-1)                 # (tb, n2, inner)
    o_all = o_all.reshape(tb * n2, inner).astype(mxu_dtype)
    out = jnp.dot(o_all, wout_ref[...], preferred_element_type=jnp.float32)   # (tb*n2, d)
    o_ref[...] = out.reshape(tb, n2, d).astype(o_ref.dtype)


def _pick_tb(bt, target, min_steps=4):
    """Largest divisor of bt that is <= target and leaves >= min_steps grid steps."""
    max_tb = bt // min_steps if bt >= min_steps else bt
    tb = max(1, min(target, max(1, max_tb)))
    while bt % tb:
        tb -= 1
    return tb


def _default_vmem_limit():
    """Generation-aware VMEM limit: ~75% of physical, capped at 96 MiB."""
    try:
        cap = int(pltpu.get_tpu_info().vmem_capacity_bytes)
    except Exception:
        cap = 64 * 1024 * 1024
    return int(min(cap * 3 // 4, 96 * 1024 * 1024))


def perceiver_attention(x, latents, params, *, heads, dim_head,
                        tb_target=32, min_grid_steps=4,
                        compute_dtype=jnp.bfloat16):
    """x: (b, T, n1, D), latents: (b, T, n2, D) -> (b, T, n2, D).

    compute_dtype: dtype for MXU matmul operands (default bf16); LayerNorm and
    softmax elementwise math always runs in f32 with f32 accumulation.
    """
    b, t, n1, d = x.shape
    _, _, n2, _ = latents.shape
    inner = heads * dim_head
    bt = b * t
    tb = _pick_tb(bt, tb_target, min_grid_steps)
    scale = dim_head ** (-0.5)

    x_f = x.reshape(bt, n1, d)
    lat_f = latents.reshape(bt, n2, d)

    w_dtype = compute_dtype if compute_dtype is not None else params["wq"].dtype

    # Packed (4, D) f32 LayerNorm params (one resident block instead of four tiles).
    lnp = jnp.stack(
        [params["norm_media_w"], params["norm_media_b"],
         params["norm_latents_w"], params["norm_latents_b"]],
        axis=0,
    ).astype(jnp.float32)

    # Fold the attention scale into to_q; fuse projection weights so the kernel
    # does two wide-N matmuls instead of five narrow ones.
    wq = params["wq"] * scale                              # (d, inner), f32 fold then cast
    wk = params["wkv"][:, :inner]
    wv = params["wkv"][:, inner:]
    w_lat = jnp.concatenate([wq, wk, wv], axis=1).astype(w_dtype)   # (d, 3*inner)
    w_x = jnp.concatenate([wk, wv], axis=1).astype(w_dtype)         # (d, 2*inner)
    wout = params["wout"].astype(w_dtype)                           # (inner, d)

    kernel = functools.partial(
        perceiver_attention_kernel, heads=heads, dim_head=dim_head
    )

    out = pl.pallas_call(
        kernel,
        out_shape=jax.ShapeDtypeStruct((bt, n2, d), x.dtype),
        grid_spec=pltpu.PrefetchScalarGridSpec(
            num_scalar_prefetch=0,
            grid=(bt // tb,),
            in_specs=[
                pl.BlockSpec((tb, n1, d), lambda i: (i, 0, 0)),
                pl.BlockSpec((tb, n2, d), lambda i: (i, 0, 0)),
                pl.BlockSpec((4, d), lambda i: (0, 0)),            # LN params (resident)
                pl.BlockSpec((d, 3 * inner), lambda i: (0, 0)),    # [wq*scale | wk | wv]
                pl.BlockSpec((d, 2 * inner), lambda i: (0, 0)),    # [wk | wv]
                pl.BlockSpec((inner, d), lambda i: (0, 0)),        # to_out
            ],
            out_specs=pl.BlockSpec((tb, n2, d), lambda i: (i, 0, 0)),
        ),
        compiler_params=pltpu.CompilerParams(
            dimension_semantics=("parallel",),
            vmem_limit_bytes=_default_vmem_limit(),
        ),
    )(x_f, lat_f, lnp, w_lat, w_x, wout)

    return out.reshape(b, t, n2, d)


def perceiver_attention_reference(x, latents, params, *, heads, dim_head):
    """Pure-JAX reference mirroring the PyTorch forward (masks=None)."""
    inner = heads * dim_head
    scale = dim_head ** (-0.5)
    xn = _layernorm(x, params["norm_media_w"], params["norm_media_b"])
    ln = _layernorm(latents, params["norm_latents_w"], params["norm_latents_b"])
    q = ln @ params["wq"]                                     # (b,T,n2,inner)
    kv_in = jnp.concatenate([xn, ln], axis=-2)                # (b,T,n,D)
    kv = kv_in @ params["wkv"]
    k, v = kv[..., :inner], kv[..., inner:]

    def to_heads(z):
        b, t, n, _ = z.shape
        return z.reshape(b, t, n, heads, dim_head).transpose(0, 3, 1, 2, 4)

    qh, kh, vh = to_heads(q), to_heads(k), to_heads(v)
    qh = qh * scale
    sim = jnp.einsum("bhtid,bhtjd->bhtij", qh, kh)
    sim = sim - jnp.max(sim, axis=-1, keepdims=True)
    attn = jax.nn.softmax(sim, axis=-1)
    out = jnp.einsum("bhtij,bhtjd->bhtid", attn, vh)
    b, h, t, n2, dh = out.shape
    out = out.transpose(0, 2, 3, 1, 4).reshape(b, t, n2, h * dh)
    return out @ params["wout"]


if __name__ == "__main__":
    # Small but lane-friendly shapes: D = inner = 128 keeps everything lane-dense;
    # bt = 16 with tb = 4 gives a 4-step grid (pipelined, both v7x cores busy).
    B, T, N1, N2, D = 2, 8, 16, 8, 128
    HEADS, DIM_HEAD = 4, 32
    INNER = HEADS * DIM_HEAD

    key = jax.random.PRNGKey(0)
    keys = jax.random.split(key, 9)

    x = jax.random.normal(keys[0], (B, T, N1, D), dtype=jnp.float32)
    latents = jax.random.normal(keys[1], (B, T, N2, D), dtype=jnp.float32)

    params = {
        # LayerNorm affine params (nonzero to exercise the code path)
        "norm_media_w": 1.0 + 0.1 * jax.random.normal(keys[2], (D,), jnp.float32),
        "norm_media_b": 0.1 * jax.random.normal(keys[3], (D,), jnp.float32),
        "norm_latents_w": 1.0 + 0.1 * jax.random.normal(keys[4], (D,), jnp.float32),
        "norm_latents_b": 0.1 * jax.random.normal(keys[5], (D,), jnp.float32),
        # Linear weights stored pre-transposed: y = x @ W  (PyTorch: x @ weight.T)
        "wq": 0.05 * jax.random.normal(keys[6], (D, INNER), jnp.float32),
        "wkv": 0.05 * jax.random.normal(keys[7], (D, 2 * INNER), jnp.float32),
        "wout": 0.05 * jax.random.normal(keys[8], (INNER, D), jnp.float32),
    }

    out = perceiver_attention(
        x, latents, params, heads=HEADS, dim_head=DIM_HEAD
    )
    out = jax.block_until_ready(out)

    ref = perceiver_attention_reference(
        x, latents, params, heads=HEADS, dim_head=DIM_HEAD
    )
    assert out.shape == (B, T, N2, D)
    err = jnp.max(jnp.abs(out - ref))
    # Tolerance covers bf16 MXU operands + the approximate (EUP) softmax reciprocal.
    assert jnp.allclose(out, ref, atol=3e-2, rtol=3e-2), f"max abs err = {err}"

    print("KERNEL_OK")
</pallas_src>

<mosaic_0001>
module attributes {stable_mosaic.version = 11 : i64} {
  func.func @perceiver_attention_kernel(%arg0: i32, %arg1: memref<4x16x128xf32, #tpu.memory_space<vmem>>, %arg2: memref<4x8x128xf32, #tpu.memory_space<vmem>>, %arg3: memref<4x128xf32, #tpu.memory_space<vmem>>, %arg4: memref<128x384xbf16, #tpu.memory_space<vmem>>, %arg5: memref<128x256xbf16, #tpu.memory_space<vmem>>, %arg6: memref<128x128xbf16, #tpu.memory_space<vmem>>, %arg7: memref<4x8x128xf32, #tpu.memory_space<vmem>>) attributes {dimension_semantics = [#tpu.dimension_semantics<parallel>], iteration_bounds = array<i64: 4>, scalar_prefetch = 0 : i64, scratch_operands = 0 : i64, tpu.core_type = #tpu.core_type<tc>, window_params = [{transform_indices = @transform_0, window_bounds = array<i64: 4, 16, 128>}, {transform_indices = @transform_1, window_bounds = array<i64: 4, 8, 128>}, {pipeline_mode = #tpu.pipeline_mode<synchronous>, transform_indices = @transform_2, window_bounds = array<i64: 4, 128>}, {pipeline_mode = #tpu.pipeline_mode<synchronous>, transform_indices = @transform_3, window_bounds = array<i64: 128, 384>}, {pipeline_mode = #tpu.pipeline_mode<synchronous>, transform_indices = @transform_4, window_bounds = array<i64: 128, 256>}, {pipeline_mode = #tpu.pipeline_mode<synchronous>, transform_indices = @transform_5, window_bounds = array<i64: 128, 128>}, {transform_indices = @transform_6, window_bounds = array<i64: 4, 8, 128>}]} {
    %c0 = arith.constant 0 : index
    %c0_0 = arith.constant 0 : index
    %0 = vector.load %arg3[%c0, %c0_0] : memref<4x128xf32, #tpu.memory_space<vmem>>, vector<4x128xf32>
    %1 = vector.extract_strided_slice %0 {offsets = [0, 0], sizes = [1, 128], strides = [1, 1]} : vector<4x128xf32> to vector<1x128xf32>
    %2 = vector.extract_strided_slice %0 {offsets = [1, 0], sizes = [1, 128], strides = [1, 1]} : vector<4x128xf32> to vector<1x128xf32>
    %3 = vector.extract_strided_slice %0 {offsets = [2, 0], sizes = [1, 128], strides = [1, 1]} : vector<4x128xf32> to vector<1x128xf32>
    %4 = vector.extract_strided_slice %0 {offsets = [3, 0], sizes = [1, 128], strides = [1, 1]} : vector<4x128xf32> to vector<1x128xf32>
    %c0_1 = arith.constant 0 : index
    %c0_2 = arith.constant 0 : index
    %c0_3 = arith.constant 0 : index
    %5 = vector.load %arg1[%c0_1, %c0_2, %c0_3] : memref<4x16x128xf32, #tpu.memory_space<vmem>>, vector<4x16x128xf32>
    %6 = vector.shape_cast %5 : vector<4x16x128xf32> to vector<64x128xf32>
    %c0_4 = arith.constant 0 : index
    %c0_5 = arith.constant 0 : index
    %c0_6 = arith.constant 0 : index
    %7 = vector.load %arg2[%c0_4, %c0_5, %c0_6] : memref<4x8x128xf32, #tpu.memory_space<vmem>>, vector<4x8x128xf32>
    %8 = vector.shape_cast %7 : vector<4x8x128xf32> to vector<32x128xf32>
    %cst = arith.constant dense<0.000000e+00> : vector<64xf32>
    %9 = vector.multi_reduction <add>, %6, %cst [1] : vector<64x128xf32> to vector<64xf32>
    %10 = vector.shape_cast %9 : vector<64xf32> to vector<64x1xf32>
    %cst_7 = arith.constant 1.280000e+02 : f32
    %11 = vector.broadcast %cst_7 : f32 to vector<64x1xf32>
    %12 = arith.divf %10, %11 : vector<64x1xf32>
    %13 = vector.broadcast %12 : vector<64x1xf32> to vector<64x128xf32>
    %14 = arith.subf %6, %13 : vector<64x128xf32>
    %15 = arith.mulf %14, %14 : vector<64x128xf32>
    %cst_8 = arith.constant dense<0.000000e+00> : vector<64xf32>
    %16 = vector.multi_reduction <add>, %15, %cst_8 [1] : vector<64x128xf32> to vector<64xf32>
    %17 = vector.shape_cast %16 : vector<64xf32> to vector<64x1xf32>
    %cst_9 = arith.constant 1.280000e+02 : f32
    %18 = vector.broadcast %cst_9 : f32 to vector<64x1xf32>
    %19 = arith.divf %17, %18 : vector<64x1xf32>
    %20 = vector.broadcast %12 : vector<64x1xf32> to vector<64x128xf32>
    %21 = arith.subf %6, %20 : vector<64x128xf32>
    %cst_10 = arith.constant 9.99999974E-6 : f32
    %22 = vector.broadcast %cst_10 : f32 to vector<64x1xf32>
    %23 = arith.addf %19, %22 : vector<64x1xf32>
    %24 = math.rsqrt %23 : vector<64x1xf32>
    %25 = vector.broadcast %24 : vector<64x1xf32> to vector<64x128xf32>
    %26 = arith.mulf %21, %25 : vector<64x128xf32>
    %27 = vector.broadcast %1 : vector<1x128xf32> to vector<64x128xf32>
    %28 = arith.mulf %26, %27 : vector<64x128xf32>
    %29 = vector.broadcast %2 : vector<1x128xf32> to vector<64x128xf32>
    %30 = arith.addf %28, %29 : vector<64x128xf32>
    %31 = arith.truncf %30 : vector<64x128xf32> to vector<64x128xbf16>
    %cst_11 = arith.constant dense<0.000000e+00> : vector<32xf32>
    %32 = vector.multi_reduction <add>, %8, %cst_11 [1] : vector<32x128xf32> to vector<32xf32>
    %33 = vector.shape_cast %32 : vector<32xf32> to vector<32x1xf32>
    %cst_12 = arith.constant 1.280000e+02 : f32
    %34 = vector.broadcast %cst_12 : f32 to vector<32x1xf32>
    %35 = arith.divf %33, %34 : vector<32x1xf32>
    %36 = vector.broadcast %35 : vector<32x1xf32> to vector<32x128xf32>
    %37 = arith.subf %8, %36 : vector<32x128xf32>
    %38 = arith.mulf %37, %37 : vector<32x128xf32>
    %cst_13 = arith.constant dense<0.000000e+00> : vector<32xf32>
    %39 = vector.multi_reduction <add>, %38, %cst_13 [1] : vector<32x128xf32> to vector<32xf32>
    %40 = vector.shape_cast %39 : vector<32xf32> to vector<32x1xf32>
    %cst_14 = arith.constant 1.280000e+02 : f32
    %41 = vector.broadcast %cst_14 : f32 to vector<32x1xf32>
    %42 = arith.divf %40, %41 : vector<32x1xf32>
    %43 = vector.broadcast %35 : vector<32x1xf32> to vector<32x128xf32>
    %44 = arith.subf %8, %43 : vector<32x128xf32>
    %cst_15 = arith.constant 9.99999974E-6 : f32
    %45 = vector.broadcast %cst_15 : f32 to vector<32x1xf32>
    %46 = arith.addf %42, %45 : vector<32x1xf32>
    %47 = math.rsqrt %46 : vector<32x1xf32>
    %48 = vector.broadcast %47 : vector<32x1xf32> to vector<32x128xf32>
    %49 = arith.mulf %44, %48 : vector<32x128xf32>
    %50 = vector.broadcast %3 : vector<1x128xf32> to vector<32x128xf32>
    %51 = arith.mulf %49, %50 : vector<32x128xf32>
    %52 = vector.broadcast %4 : vector<1x128xf32> to vector<32x128xf32>
    %53 = arith.addf %51, %52 : vector<32x128xf32>
    %54 = arith.truncf %53 : vector<32x128xf32> to vector<32x128xbf16>
    %c0_16 = arith.constant 0 : index
    %c0_17 = arith.constant 0 : index
    %55 = vector.load %arg4[%c0_16, %c0_17] : memref<128x384xbf16, #tpu.memory_space<vmem>>, vector<128x384xbf16>
    %cst_18 = arith.constant dense<0.000000e+00> : vector<32x384xf32>
    %56 = tpu.matmul %54, %55, %cst_18 {dimension_numbers = #tpu.dot_dimension_numbers<[1], [0], [0], [1], [0, 0, 1, 1], [], []>} : vector<32x128xbf16>, vector<128x384xbf16>, vector<32x384xf32> -> vector<32x384xf32>
    %c0_19 = arith.constant 0 : index
    %c0_20 = arith.constant 0 : index
    %57 = vector.load %arg5[%c0_19, %c0_20] : memref<128x256xbf16, #tpu.memory_space<vmem>>, vector<128x256xbf16>
    %cst_21 = arith.constant dense<0.000000e+00> : vector<64x256xf32>
    %58 = tpu.matmul %31, %57, %cst_21 {dimension_numbers = #tpu.dot_dimension_numbers<[1], [0], [0], [1], [0, 0, 1, 1], [], []>} : vector<64x128xbf16>, vector<128x256xbf16>, vector<64x256xf32> -> vector<64x256xf32>
    %59 = vector.extract_strided_slice %56 {offsets = [0, 0], sizes = [32, 128], strides = [1, 1]} : vector<32x384xf32> to vector<32x128xf32>
    %60 = vector.shape_cast %59 : vector<32x128xf32> to vector<4x8x128xf32>
    %61 = arith.truncf %60 : vector<4x8x128xf32> to vector<4x8x128xbf16>
    %62 = vector.extract_strided_slice %56 {offsets = [0, 128], sizes = [32, 128], strides = [1, 1]} : vector<32x384xf32> to vector<32x128xf32>
    %63 = vector.shape_cast %62 : vector<32x128xf32> to vector<4x8x128xf32>
    %64 = vector.extract_strided_slice %56 {offsets = [0, 256], sizes = [32, 128], strides = [1, 1]} : vector<32x384xf32> to vector<32x128xf32>
    %65 = vector.shape_cast %64 : vector<32x128xf32> to vector<4x8x128xf32>
    %66 = vector.extract_strided_slice %58 {offsets = [0, 0], sizes = [64, 128], strides = [1, 1]} : vector<64x256xf32> to vector<64x128xf32>
    %67 = vector.shape_cast %66 : vector<64x128xf32> to vector<4x16x128xf32>
    %68 = vector.extract_strided_slice %58 {offsets = [0, 128], sizes = [64, 128], strides = [1, 1]} : vector<64x256xf32> to vector<64x128xf32>
    %69 = vector.shape_cast %68 : vector<64x128xf32> to vector<4x16x128xf32>
    %70 = tpu.concatenate %67, %63 in 1 : vector<4x16x128xf32>, vector<4x8x128xf32> -> vector<4x24x128xf32>
    %71 = arith.truncf %70 : vector<4x24x128xf32> to vector<4x24x128xbf16>
    %72 = tpu.concatenate %69, %65 in 1 : vector<4x16x128xf32>, vector<4x8x128xf32> -> vector<4x24x128xf32>
    %73 = arith.truncf %72 : vector<4x24x128xf32> to vector<4x24x128xbf16>
    %74 = vector.extract_strided_slice %61 {offsets = [0, 0, 0], sizes = [4, 8, 32], strides = [1, 1, 1]} : vector<4x8x128xbf16> to vector<4x8x32xbf16>
    %75 = vector.extract_strided_slice %71 {offsets = [0, 0, 0], sizes = [4, 24, 32], strides = [1, 1, 1]} : vector<4x24x128xbf16> to vector<4x24x32xbf16>
    %cst_22 = arith.constant dense<0.000000e+00> : vector<4x8x24xf32>
    %76 = tpu.matmul %74, %75, %cst_22 {dimension_numbers = #tpu.dot_dimension_numbers<[2], [2], [1], [1], [0, 0, 0, 1, 1, 1], [0], [0]>} : vector<4x8x32xbf16>, vector<4x24x32xbf16>, vector<4x8x24xf32> -> vector<4x8x24xf32>
    %cst_23 = arith.constant dense<0xFF800000> : vector<4x8xf32>
    %77 = vector.multi_reduction <maximumf>, %76, %cst_23 [2] : vector<4x8x24xf32> to vector<4x8xf32>
    %78 = vector.shape_cast %77 : vector<4x8xf32> to vector<4x8x1xf32>
    %79 = vector.broadcast %78 : vector<4x8x1xf32> to vector<4x8x24xf32>
    %80 = arith.subf %76, %79 : vector<4x8x24xf32>
    %81 = math.exp %80 : vector<4x8x24xf32>
    %cst_24 = arith.constant dense<0.000000e+00> : vector<4x8xf32>
    %82 = vector.multi_reduction <add>, %81, %cst_24 [2] : vector<4x8x24xf32> to vector<4x8xf32>
    %83 = vector.shape_cast %82 : vector<4x8xf32> to vector<4x8x1xf32>
    %84 = tpu.reciprocal %83 {approx = true} : vector<4x8x1xf32> -> vector<4x8x1xf32>
    %85 = arith.truncf %81 : vector<4x8x24xf32> to vector<4x8x24xbf16>
    %86 = vector.extract_strided_slice %73 {offsets = [0, 0, 0], sizes = [4, 24, 32], strides = [1, 1, 1]} : vector<4x24x128xbf16> to vector<4x24x32xbf16>
    %cst_25 = arith.constant dense<0.000000e+00> : vector<4x8x32xf32>
    %87 = tpu.matmul %85, %86, %cst_25 {dimension_numbers = #tpu.dot_dimension_numbers<[2], [1], [1], [2], [0, 0, 0, 1, 1, 2], [0], [0]>} : vector<4x8x24xbf16>, vector<4x24x32xbf16>, vector<4x8x32xf32> -> vector<4x8x32xf32>
    %88 = vector.broadcast %84 : vector<4x8x1xf32> to vector<4x8x32xf32>
    %89 = arith.mulf %87, %88 : vector<4x8x32xf32>
    %90 = vector.extract_strided_slice %61 {offsets = [0, 0, 32], sizes = [4, 8, 32], strides = [1, 1, 1]} : vector<4x8x128xbf16> to vector<4x8x32xbf16>
    %91 = vector.extract_strided_slice %71 {offsets = [0, 0, 32], sizes = [4, 24, 32], strides = [1, 1, 1]} : vector<4x24x128xbf16> to vector<4x24x32xbf16>
    %cst_26 = arith.constant dense<0.000000e+00> : vector<4x8x24xf32>
    %92 = tpu.matmul %90, %91, %cst_26 {dimension_numbers = #tpu.dot_dimension_numbers<[2], [2], [1], [1], [0, 0, 0, 1, 1, 1], [0], [0]>} : vector<4x8x32xbf16>, vector<4x24x32xbf16>, vector<4x8x24xf32> -> vector<4x8x24xf32>
    %cst_27 = arith.constant dense<0xFF800000> : vector<4x8xf32>
    %93 = vector.multi_reduction <maximumf>, %92, %cst_27 [2] : vector<4x8x24xf32> to vector<4x8xf32>
    %94 = vector.shape_cast %93 : vector<4x8xf32> to vector<4x8x1xf32>
    %95 = vector.broadcast %94 : vector<4x8x1xf32> to vector<4x8x24xf32>
    %96 = arith.subf %92, %95 : vector<4x8x24xf32>
    %97 = math.exp %96 : vector<4x8x24xf32>
    %cst_28 = arith.constant dense<0.000000e+00> : vector<4x8xf32>
    %98 = vector.multi_reduction <add>, %97, %cst_28 [2] : vector<4x8x24xf32> to vector<4x8xf32>
    %99 = vector.shape_cast %98 : vector<4x8xf32> to vector<4x8x1xf32>
    %100 = tpu.reciprocal %99 {approx = true} : vector<4x8x1xf32> -> vector<4x8x1xf32>
    %101 = arith.truncf %97 : vector<4x8x24xf32> to vector<4x8x24xbf16>
    %102 = vector.extract_strided_slice %73 {offsets = [0, 0, 32], sizes = [4, 24, 32], strides = [1, 1, 1]} : vector<4x24x128xbf16> to vector<4x24x32xbf16>
    %cst_29 = arith.constant dense<0.000000e+00> : vector<4x8x32xf32>
    %103 = tpu.matmul %101, %102, %cst_29 {dimension_numbers = #tpu.dot_dimension_numbers<[2], [1], [1], [2], [0, 0, 0, 1, 1, 2], [0], [0]>} : vector<4x8x24xbf16>, vector<4x24x32xbf16>, vector<4x8x32xf32> -> vector<4x8x32xf32>
    %104 = vector.broadcast %100 : vector<4x8x1xf32> to vector<4x8x32xf32>
    %105 = arith.mulf %103, %104 : vector<4x8x32xf32>
    %106 = vector.extract_strided_slice %61 {offsets = [0, 0, 64], sizes = [4, 8, 32], strides = [1, 1, 1]} : vector<4x8x128xbf16> to vector<4x8x32xbf16>
    %107 = vector.extract_strided_slice %71 {offsets = [0, 0, 64], sizes = [4, 24, 32], strides = [1, 1, 1]} : vector<4x24x128xbf16> to vector<4x24x32xbf16>
    %cst_30 = arith.constant dense<0.000000e+00> : vector<4x8x24xf32>
    %108 = tpu.matmul %106, %107, %cst_30 {dimension_numbers = #tpu.dot_dimension_numbers<[2], [2], [1], [1], [0, 0, 0, 1, 1, 1], [0], [0]>} : vector<4x8x32xbf16>, vector<4x24x32xbf16>, vector<4x8x24xf32> -> vector<4x8x24xf32>
    %cst_31 = arith.constant dense<0xFF800000> : vector<4x8xf32>
    %109 = vector.multi_reduction <maximumf>, %108, %cst_31 [2] : vector<4x8x24xf32> to vector<4x8xf32>
    %110 = vector.shape_cast %109 : vector<4x8xf32> to vector<4x8x1xf32>
    %111 = vector.broadcast %110 : vector<4x8x1xf32> to vector<4x8x24xf32>
    %112 = arith.subf %108, %111 : vector<4x8x24xf32>
    %113 = math.exp %112 : vector<4x8x24xf32>
    %cst_32 = arith.constant dense<0.000000e+00> : vector<4x8xf32>
    %114 = vector.multi_reduction <add>, %113, %cst_32 [2] : vector<4x8x24xf32> to vector<4x8xf32>
    %115 = vector.shape_cast %114 : vector<4x8xf32> to vector<4x8x1xf32>
    %116 = tpu.reciprocal %115 {approx = true} : vector<4x8x1xf32> -> vector<4x8x1xf32>
    %117 = arith.truncf %113 : vector<4x8x24xf32> to vector<4x8x24xbf16>
    %118 = vector.extract_strided_slice %73 {offsets = [0, 0, 64], sizes = [4, 24, 32], strides = [1, 1, 1]} : vector<4x24x128xbf16> to vector<4x24x32xbf16>
    %cst_33 = arith.constant dense<0.000000e+00> : vector<4x8x32xf32>
    %119 = tpu.matmul %117, %118, %cst_33 {dimension_numbers = #tpu.dot_dimension_numbers<[2], [1], [1], [2], [0, 0, 0, 1, 1, 2], [0], [0]>} : vector<4x8x24xbf16>, vector<4x24x32xbf16>, vector<4x8x32xf32> -> vector<4x8x32xf32>
    %120 = vector.broadcast %116 : vector<4x8x1xf32> to vector<4x8x32xf32>
    %121 = arith.mulf %119, %120 : vector<4x8x32xf32>
    %122 = vector.extract_strided_slice %61 {offsets = [0, 0, 96], sizes = [4, 8, 32], strides = [1, 1, 1]} : vector<4x8x128xbf16> to vector<4x8x32xbf16>
    %123 = vector.extract_strided_slice %71 {offsets = [0, 0, 96], sizes = [4, 24, 32], strides = [1, 1, 1]} : vector<4x24x128xbf16> to vector<4x24x32xbf16>
    %cst_34 = arith.constant dense<0.000000e+00> : vector<4x8x24xf32>
    %124 = tpu.matmul %122, %123, %cst_34 {dimension_numbers = #tpu.dot_dimension_numbers<[2], [2], [1], [1], [0, 0, 0, 1, 1, 1], [0], [0]>} : vector<4x8x32xbf16>, vector<4x24x32xbf16>, vector<4x8x24xf32> -> vector<4x8x24xf32>
    %cst_35 = arith.constant dense<0xFF800000> : vector<4x8xf32>
    %125 = vector.multi_reduction <maximumf>, %124, %cst_35 [2] : vector<4x8x24xf32> to vector<4x8xf32>
    %126 = vector.shape_cast %125 : vector<4x8xf32> to vector<4x8x1xf32>
    %127 = vector.broadcast %126 : vector<4x8x1xf32> to vector<4x8x24xf32>
    %128 = arith.subf %124, %127 : vector<4x8x24xf32>
    %129 = math.exp %128 : vector<4x8x24xf32>
    %cst_36 = arith.constant dense<0.000000e+00> : vector<4x8xf32>
    %130 = vector.multi_reduction <add>, %129, %cst_36 [2] : vector<4x8x24xf32> to vector<4x8xf32>
    %131 = vector.shape_cast %130 : vector<4x8xf32> to vector<4x8x1xf32>
    %132 = tpu.reciprocal %131 {approx = true} : vector<4x8x1xf32> -> vector<4x8x1xf32>
    %133 = arith.truncf %129 : vector<4x8x24xf32> to vector<4x8x24xbf16>
    %134 = vector.extract_strided_slice %73 {offsets = [0, 0, 96], sizes = [4, 24, 32], strides = [1, 1, 1]} : vector<4x24x128xbf16> to vector<4x24x32xbf16>
    %cst_37 = arith.constant dense<0.000000e+00> : vector<4x8x32xf32>
    %135 = tpu.matmul %133, %134, %cst_37 {dimension_numbers = #tpu.dot_dimension_numbers<[2], [1], [1], [2], [0, 0, 0, 1, 1, 2], [0], [0]>} : vector<4x8x24xbf16>, vector<4x24x32xbf16>, vector<4x8x32xf32> -> vector<4x8x32xf32>
    %136 = vector.broadcast %132 : vector<4x8x1xf32> to vector<4x8x32xf32>
    %137 = arith.mulf %135, %136 : vector<4x8x32xf32>
    %138 = tpu.concatenate %89, %105, %121, %137 in 2 : vector<4x8x32xf32>, vector<4x8x32xf32>, vector<4x8x32xf32>, vector<4x8x32xf32> -> vector<4x8x128xf32>
    %139 = vector.shape_cast %138 : vector<4x8x128xf32> to vector<32x128xf32>
    %140 = arith.truncf %139 : vector<32x128xf32> to vector<32x128xbf16>
    %c0_38 = arith.constant 0 : index
    %c0_39 = arith.constant 0 : index
    %141 = vector.load %arg6[%c0_38, %c0_39] : memref<128x128xbf16, #tpu.memory_space<vmem>>, vector<128x128xbf16>
    %cst_40 = arith.constant dense<0.000000e+00> : vector<32x128xf32>
    %142 = tpu.matmul %140, %141, %cst_40 {dimension_numbers = #tpu.dot_dimension_numbers<[1], [0], [0], [1], [0, 0, 1, 1], [], []>} : vector<32x128xbf16>, vector<128x128xbf16>, vector<32x128xf32> -> vector<32x128xf32>
    %143 = vector.shape_cast %142 : vector<32x128xf32> to vector<4x8x128xf32>
    %c0_41 = arith.constant 0 : index
    %c0_42 = arith.constant 0 : index
    %c0_43 = arith.constant 0 : index
    %144 = vector.load %arg7[%c0_41, %c0_42, %c0_43] : memref<4x8x128xf32, #tpu.memory_space<vmem>>, vector<4x8x128xf32>
    tpu.vector_store %arg7[%c0_41, %c0_42, %c0_43], %143 {strides = array<i32>} : memref<4x8x128xf32, #tpu.memory_space<vmem>>, vector<4x8x128xf32>,
    return
  }
  func.func @transform_0(%arg0: i32) -> (i32, i32, i32) {
    %c0_i32 = arith.constant 0 : i32
    %c0_i32_0 = arith.constant 0 : i32
    %c0_i32_1 = arith.constant 0 : i32
    return %arg0, %c0_i32, %c0_i32_0 : i32, i32, i32
  }
  func.func @transform_1(%arg0: i32) -> (i32, i32, i32) {
    %c0_i32 = arith.constant 0 : i32
    %c0_i32_0 = arith.constant 0 : i32
    %c0_i32_1 = arith.constant 0 : i32
    return %arg0, %c0_i32, %c0_i32_0 : i32, i32, i32
  }
  func.func @transform_2(%arg0: i32) -> (i32, i32) {
    %c0_i32 = arith.constant 0 : i32
    %c0_i32_0 = arith.constant 0 : i32
    %c0_i32_1 = arith.constant 0 : i32
    return %c0_i32, %c0_i32_0 : i32, i32
  }
  func.func @transform_3(%arg0: i32) -> (i32, i32) {
    %c0_i32 = arith.constant 0 : i32
    %c0_i32_0 = arith.constant 0 : i32
    %c0_i32_1 = arith.constant 0 : i32
    return %c0_i32, %c0_i32_0 : i32, i32
  }
  func.func @transform_4(%arg0: i32) -> (i32, i32) {
    %c0_i32 = arith.constant 0 : i32
    %c0_i32_0 = arith.constant 0 : i32
    %c0_i32_1 = arith.constant 0 : i32
    return %c0_i32, %c0_i32_0 : i32, i32
  }
  func.func @transform_5(%arg0: i32) -> (i32, i32) {
    %c0_i32 = arith.constant 0 : i32
    %c0_i32_0 = arith.constant 0 : i32
    %c0_i32_1 = arith.constant 0 : i32
    return %c0_i32, %c0_i32_0 : i32, i32
  }
  func.func @transform_6(%arg0: i32) -> (i32, i32, i32) {
    %c0_i32 = arith.constant 0 : i32
    %c0_i32_0 = arith.constant 0 : i32
    %c0_i32_1 = arith.constant 0 : i32
    return %arg0, %c0_i32, %c0_i32_0 : i32, i32, i32
  }
}

</mosaic_0001>

<bundles_post_ra>
// kernel: tpu_custom_call.1
= control target key start
LH: loop header
LB: loop body
LE: loop exit
PB: predicated region body
PF: predicated region fallthrough
CT: control target
= control target key end

     0   :  { %s4209_s0 = inlined_call_operand.hbm [shape: f32[16,16,128], index: 0, kind: input, shape index: {}]   ;;  %s4210_s1 = inlined_call_operand.hbm [shape: f32[16,8,128], index: 1, kind: input, shape index: {}]   ;;  %s4211_s2 = inlined_call_operand.hbm [shape: f32[4,128], index: 2, kind: input, shape index: {}]   ;;  %s4212_s3 = inlined_call_operand.hbm [shape: bf16[128,384], index: 3, kind: input, shape index: {}]   ;;  %s4213_s4 = inlined_call_operand.hbm [shape: bf16[128,256], index: 4, kind: input, shape index: {}]   ;;  %s4214_s5 = inlined_call_operand.hbm [shape: bf16[128,128], index: 5, kind: input, shape index: {}]   ;;  %s4215_s6 = inlined_call_operand.hbm [shape: f32[16,8,128], index: 6, kind: output, shape index: {}]  }
   0x1   :  { %4220 = sst [smem:[#allocation21_spill]] %s4211_s2 }
   0x2   :  { %4221 = sst [smem:[#allocation22_spill]] %s4212_s3 }
   0x3   :  { %4222 = sst [smem:[#allocation23_spill]] %s4213_s4 }
   0x4   :  { %4223 = sst [smem:[#allocation24_spill]] %s4214_s5 }
   0x5   :  { %11 = vsyncpa [#allocation3], 0 }
   0x6   :  { %13 = vsyncpa [#allocation3 + $0x1], 0 }
   0x7   :  { %14 = vsyncpa [#allocation6], 0 }
   0x8   :  { %16 = vsyncpa [#allocation6 + $0x1], 0 }
   0x9   :  { %17 = vsyncpa [#allocation9], 0 }
   0xa   :  { %18 = vsyncpa [#allocation12], 0 }
   0xb   :  { %19 = vsyncpa [#allocation4], 0 }
   0xc   :  { %21 = vsyncpa [#allocation4 + $0x1], 0  ;;  %s3282_s21 = smov 0   ;;  %s3284_s22 = smov 0  }
   0xd   :  { %s3286_s23 = smov 0   ;;  %s3288_s24 = smov 0  }
   0xe LB: > { %s3303_s25 = sadd.s32 4294967295, %s3229_s24   ;;  %s2440_s26 = sadd.s32 4294967294, %s3229_s24   ;;  %s3229_s24 = sphi %s3288_s24, %s4249_s24   ;;  %s3225_s23 = sphi %s3286_s23, %s4248_s23   ;;  %s3221_s22 = sphi %s3284_s22, %s4247_s22   ;;  %s3217_s21 = sphi %s3282_s21, %s4246_s21  }
   0xf   : > { %p47_p0 = scmp.ne.s32.totalorder %s3221_s22, %s3217_s21  ;;  %p48_p1 = scmp.eq.s32.totalorder %s3303_s25, 0 }
  0x10   : > { %p181_p2 = scmp.eq.s32.totalorder %s3303_s25, 3  ;;  %p187_p3 = scmp.eq.s32.totalorder %s2440_s26, 3 }
  0x11   : > { %p3312_p4 = por %p48_p1, %p47_p0  ;;  %p2441_p5 = scmp.ge.s32.totalorder %s3229_s24, 1 }
  0x12   : > { %p3317_p6 = por %p187_p3, %p47_p0  ;;  %p194_p7 = scmp.lt.s32.totalorder %s3229_s24, 5 }
  0x13   : > { %s4226_s2 = sld [smem:[#allocation21_spill]]  ;;  %s3231_s9 = smov [#allocation7]  }
  0x14   : > { %p3325_p8 = pnand %p2441_p5, %p194_p7  ;;  %s208_s10 = sshll.u32 %s3231_s9, 4  ;;  %s209_s10 = int_to_ptr.vmem [resolvable:$true] %s208_s10 }
  0x15   : > { %s4228_s3 = sld [smem:[#allocation22_spill]]  ;;  %s3232_s15 = smov [#allocation8]  }
  0x16   : > { %p2765_p9 = pneg %p3325_p8  ;;  %s219_s16 = sshll.u32 %s3232_s15, 4  ;;  %s220_s16 = int_to_ptr.vmem [resolvable:$true] %s219_s16 }
  0x17   : > { %s3233_s17 = smov 192   ;;  %s3234_s18 = smov 12  }
  0x18   : > { %p3336_p10 = pnand %p2765_p9, %p48_p1  ;;  %s4230_s4 = sld [smem:[#allocation23_spill]] }
  0x19   : > { %s206_s7 = sshll.u32 %s4226_s2, 4  ;;  %s3235_s29 = smov [#allocation10]   ;;  %s207_s7 = int_to_ptr.hbm [resolvable:$true] %s206_s7 }
  0x1a   : > { %2768 = dma.hbm_to_vmem [thread:$0]  (!%p3336_p10), %s207_s7, 64, %s209_s10, [#allocation6]  }
  0x1b   : > { %s217_s13 = sshll.u32 %s4228_s3, 4  ;;  %s233_s30 = sshll.u32 %s3235_s29, 4  ;;  %s218_s13 = int_to_ptr.hbm [resolvable:$true] %s217_s13  ;;  %s234_s30 = int_to_ptr.vmem [resolvable:$true] %s233_s30 }
  0x1c   : > { %2771 = dma.hbm_to_vmem [thread:$0]  (!%p3336_p10), %s218_s13, 3072, %s220_s16, [#allocation9], %s3233_s17, %s3233_s17, %s3234_s18  }
  0x1d   : > { %s4231_s5 = sld [smem:[#allocation24_spill]]  ;;  %s4216_s10 = smov 128  }
  0x1e   : > { %s231_s26 = sshll.u32 %s4230_s4, 4  ;;  %s4218_s12 = smov 8   ;;  %s232_s26 = int_to_ptr.hbm [resolvable:$true] %s231_s26 }
  0x1f   : > { %2774 = dma.hbm_to_vmem [thread:$0]  (!%p3336_p10), %s232_s26, 2048, %s234_s30, [#allocation9], %s4216_s10, %s4216_s10, %s4218_s12  }
  0x20   : > { %s3238_s13 = smov [#allocation11]   ;;  %s3239_s16 = smov 64  }
  0x21   : > { %s247_s15 = sshll.u32 %s3238_s13, 4  ;;  %s3240_s17 = smov 4   ;;  %s248_s15 = int_to_ptr.vmem [resolvable:$true] %s247_s15 }
  0x22   : > { %s3358_s18 = sadd.s32 1, %s3229_s24   ;;  %s34_s20 = sadd.s32 1, %s3225_s23 }
  0x23   : > { %s245_s7 = sshll.u32 %s4231_s5, 4  ;;  %s31_s19 = ssub.s32 %s3229_s24, %s3358_s18  ;;  %s246_s7 = int_to_ptr.hbm [resolvable:$true] %s245_s7 }
  0x24   : > { %2777 = dma.hbm_to_vmem [thread:$0]  (!%p3336_p10), %s246_s7, 1024, %s248_s15, [#allocation12], %s3239_s16, %s3239_s16, %s3240_s17  }
  0x25   : > { %p32_p11 = scmp.eq.s32.totalorder %s31_s19, 0  ;;  %p41_p12 = scmp.ne.s32.totalorder %s3225_s23, %s3221_s22 }
  0x26   : > { %p42_p13 = scmp.eq.s32.totalorder %s3229_s24, 0  ;;  %p2793_p5 = scmp.lt.s32.totalorder %s3229_s24, 4 }
  0x27   : > { %s3367_s26 = scalar_select %p32_p11, %s3225_s23, %s34_s20  }
  0x28   : > { %p43_p0 = por %p42_p13, %p41_p12  ;;  %p3371_p3 = por %p181_p2, %p41_p12 }
  0x29   : > { %4232 = sst [smem:[#allocation20_spill]] %s3367_s26  ;;  %s3377_s14 = sand.u32 1, %s3225_s23  }
  0x2a   : > { %s2447_s30 = sshll.u32 %s3377_s14, 6  ;;  %s2692_s9 = sshll.u32 %s3229_s24, 6 }
  0x2b   : > { %s271_s13 = scalar_lea.hbm %s4209_s0, %s2692_s9  ;;  %s265_s15 = scalar_lea.vmem [#allocation2], %s2447_s30 }
  0x2c   : > { %s274_s16 = sshll.u32 %s265_s15, 4  ;;  %s272_s17 = sshll.u32 %s271_s13, 4  ;;  %s275_s16 = int_to_ptr.vmem [resolvable:$true] %s274_s16  ;;  %s273_s17 = int_to_ptr.hbm [resolvable:$true] %s272_s17 }
  0x2d   : > { %p3384_p2 = pnand %p2793_p5, %p43_p0  ;;  %s284_s20 = sand.u32 1, %s3229_s24  }
  0x2e   : > { %s2451_s10 = sshll.u32 %s3377_s14, 5  ;;  %s262_s12 = scalar_lea.sflag [#allocation3], %s3377_s14 }
  0x2f   : > { %s3087_s2 = sshra.s32 %s273_s17, 4  ;;  %p3091_p9 = pneg %p3384_p2  ;;  %s3088_s2 = int_to_ptr.hbm [resolvable:$true] %s3087_s2 }
  0x30   : > { %s3089_s3 = scalar_lea.hbm %s3088_s2, 64  ;;  %s3094_s11 = scalar_lea.hbm %s4209_s0, 256 }
  0x31   : > { %p3090_p7 = scmp.ne.s32.totalorder %s3088_s2, %s3089_s3  ;;  %p3095_p12 = scmp.lt.s32.totalorder %s3088_s2, %s4209_s0 }
  0x32   : > { %p3096_p13 = scmp.lt.s32.totalorder %s3094_s11, %s3089_s3 }
  0x33   : > { %p3092_p10 = pnand %p3091_p9, %p3090_p7 }
  0x34   : > { %p3097_p0 = por %p3096_p13, %p3095_p12 }
  0x35   : > { %p3093_p11 = pneg %p3092_p10 }
  0x37   : > { %p3098_p5 = pnand %p3097_p0, %p3093_p11 }
  0x39   : > { %3101 = shalt.err (!%p3098_p5)
}
  0x3a   : > { %s4235_s14 = smov 8   ;;  %s4236_s15 = smov 128  }
  0x3b   : > { %2781 = dma.hbm_to_vmem [thread:$0]  (!%p3384_p2), %s273_s17, 1024, %s275_s16, %s262_s12, %s4236_s15, %s4236_s15, %s4235_s14  }
  0x3c   : > { %s2693_s4 = sshll.u32 %s3229_s24, 5  ;;  %s288_s26 = scalar_lea.vmem [#allocation5], %s2451_s10 }
  0x3d   : > { %s293_s9 = scalar_lea.hbm %s4210_s1, %s2693_s4  ;;  %s296_s7 = sshll.u32 %s288_s26, 4  ;;  %s297_s7 = int_to_ptr.vmem [resolvable:$true] %s296_s7 }
  0x3e   : > { %s294_s2 = sshll.u32 %s293_s9, 4  ;;  %s285_s3 = scalar_lea.sflag [#allocation6], %s284_s20  ;;  %s295_s2 = int_to_ptr.hbm [resolvable:$true] %s294_s2 }
  0x3f   : > { %s3117_s11 = sshra.s32 %s295_s2, 4  ;;  %s3124_s17 = scalar_lea.hbm %s4210_s1, 128  ;;  %s3118_s11 = int_to_ptr.hbm [resolvable:$true] %s3117_s11 }
  0x40   : > { %s3119_s13 = scalar_lea.hbm %s3118_s11, 32  ;;  %p3125_p12 = scmp.lt.s32.totalorder %s3118_s11, %s4210_s1 }
  0x41   : > { %p3120_p7 = scmp.ne.s32.totalorder %s3118_s11, %s3119_s13  ;;  %p3126_p13 = scmp.lt.s32.totalorder %s3124_s17, %s3119_s13 }
  0x43   : > { %p3122_p10 = pnand %p3120_p7, %p3091_p9  ;;  %p3127_p0 = por %p3126_p13, %p3125_p12 }
  0x45   : > { %p3123_p11 = pneg %p3122_p10 }
  0x47   : > { %p3128_p5 = pnand %p3127_p0, %p3123_p11 }
  0x49   : > { %3131 = shalt.err (!%p3128_p5)
}
  0x4a   : > { %2784 = dma.hbm_to_vmem [thread:$0]  (!%p3384_p2), %s295_s2, 512, %s297_s7, %s285_s3, %s4236_s15, %s4236_s15, %s4235_s14  }
  0x4b   : > { %308 = sbr.rel (%p3325_p8) target bundleno = 2211 (0x8a3), region = 44  ;;  %s3428_s10 = sand.u32 (!%p3325_p8), 1, %s3221_s22  }
  0x4c   : > { %s2455_s26 = sshll.u32 (!%p3325_p8), %s3428_s10, 6  ;;  %s311_s20 = scalar_lea.sflag (!%p3325_p8), [#allocation3], %s3428_s10 }
  0x4d   : > { %s3432_s30 = scalar_lea.vmem (!%p3325_p8), [#allocation2], %s2455_s26 }
  0x50   : > { %3192 = dma.done.wait (%p3312_p4), %s311_s20, 1024  }
  0x51   : > { %3194 = vsyncadd (%p3312_p4), %s311_s20, 4294966272  ;;  %s320_s8 = sand.u32 1, %s3303_s25   ;;  %s2456_s19 = sshll.u32 %s3428_s10, 5 }
  0x52   : > { %s321_s14 = scalar_lea.sflag [#allocation6], %s320_s8  ;;  %s324_s15 = scalar_lea.vmem [#allocation5], %s2456_s19 }
  0x53   : > { %3196 = dma.done.wait (%p3312_p4), %s321_s14, 512  }
  0x54   : > { %3198 = vsyncadd (%p3312_p4), %s321_s14, 4294966784 }
  0x55   : > { %3200 = dma.done.wait (%p48_p1), [#allocation6], 64  }
  0x56   : > { %3202 = vsyncadd (%p48_p1), [#allocation6], 4294967232 }
  0x57   : > { %3204 = dma.done.wait (%p48_p1), [#allocation9], 5120  }
  0x58   : > { %3206 = vsyncadd (%p48_p1), [#allocation9], 4294962176 }
  0x59   : > { %3208 = dma.done.wait (%p48_p1), [#allocation12], 1024  }
  0x5a   : > { %3210 = vsyncadd (%p48_p1), [#allocation12], 4294966272  ;;  %v394_v0 = vld [vmem:[%s324_s15 + $0x10] sm:$0xff]  ;;  %v392_v1 = vld [vmem:[%s324_s15] sm:$0xff]  ;;  %v3241_v7 = vmov 128.0   ;;  %s3242_s27 = smov 96  }
  0x5b   : > { %589 = vadd.xlane.f32.xlu1 %v394_v0  ;;  %585 = vadd.xlane.f32.xlu0 %v392_v1  ;;  %v384_v2 = vld [vmem:[%s3432_s30] sm:$0xff]  ;;  %v395_v3 = vld [vmem:[%s324_s15 + $0x18] sm:$0xff]  ;;  %v393_v4 = vld [vmem:[%s324_s15 + $0x8] sm:$0xff]  ;;  %2877 = vrcp.f32 %v3241_v7  ;;  %s3243_s9 = smov 64   ;;  %s3244_s7 = smov 32  }
  0x5c   : > { %396 = vadd.xlane.f32.xlu2 %v384_v2  ;;  %v385_v5 = vld [vmem:[%s3432_s30 + $0x8] sm:$0xff]  ;;  %v386_v6 = vld [vmem:[%s3432_s30 + $0x10] sm:$0xff]  ;;  %v3476_v27 = vld [vmem:[%s3432_s30 + $0x18] sm:$0xff]  ;;  %s378_s2 = scalar_lea.vmem [#allocation13], %s2456_s19  ;;  %s2742_s3 = sshll.u32 %s3303_s25, 5 }
  0x5d   : > { %v3492_v36 = vld [vmem:[%s3432_s30 + $0x20] sm:$0xff]  ;;  %v3503_v42 = vld [vmem:[%s3432_s30 + $0x28] sm:$0xff]  ;;  %v3511_v45 = vld [vmem:[%s3432_s30 + $0x30] sm:$0xff]  ;;  %s2302_s12 = scalar_lea.hbm %s4215_s6, %s2742_s3  ;;  %s2303_s16 = sshll.u32 %s378_s2, 4  ;;  %s2304_s16 = int_to_ptr.vmem [resolvable:$true] %s2303_s16 }
  0x5e   : > { %v3515_v46 = vld [vmem:[%s3432_s30 + $0x38] sm:$0xff]  ;;  %v2548_v47 = vld [vmem:[#allocation8 + $0xa8] sm:$0xf]  ;;  %v2715_v49 = vld [vmem:[#allocation8 + $0xac] sm:$0xf]  ;;  %s2305_s17 = sshll.u32 %s2302_s12, 4  ;;  %s2306_s17 = int_to_ptr.hbm [resolvable:$true] %s2305_s17 }
  0x5f   : > { %v2716_v48 = vld [vmem:[#allocation8 + $0xb0] sm:$0xf0]  ;;  %v2550_v51 = vld [vmem:[#allocation8 + $0xb4] sm:$0xf0]  ;;  %v2556_v52 = vld [vmem:[#allocation8 + $0xb0] sm:$0xf] }
  0x60   : > { %v2549_v50 = vor.u32 %v2716_v48, %v2548_v47  ;;  %v2717_v53 = vld [vmem:[#allocation8 + $0xb8] sm:$0xf0]  ;;  %v2553_v54 = vor.u32 %v2715_v49, %v2550_v51  ;;  %v2536_v56 = vld [vmem:[#allocation8 + $0x90] sm:$0xf]  ;;  %v2712_v58 = vld [vmem:[#allocation8 + $0x94] sm:$0xf] }
  0x61   : > { %v2878_v8 = vpop.eup %2877  ;;  %v2557_v55 = vor.u32 %v2717_v53, %v2556_v52  ;;  %v2713_v57 = vld [vmem:[#allocation8 + $0x98] sm:$0xf0]  ;;  %v2538_v60 = vld [vmem:[#allocation8 + $0x9c] sm:$0xf0]  ;;  %v2544_v61 = vld [vmem:[#allocation8 + $0x98] sm:$0xf] }
  0x62   : > { %v413_v9 = vmul.f32 128.0, %v2878_v8  ;;  %vm417_vm0 = vweird.f32 %v2878_v8  ;;  %837 = vmatpush.bf16.msra.mxu0 %v2549_v50  ;;  %856 = vmatpush.bf16.msra.mxu1 %v2553_v54  ;;  %v2537_v59 = vor.u32 %v2713_v57, %v2536_v56  ;;  %v2714_v62 = vld [vmem:[#allocation8 + $0xa0] sm:$0xf0]  ;;  %v2541_v63 = vor.u32 %v2712_v58, %v2538_v60  ;;  %v2711_v7 = vld [vmem:[#allocation8 + $0x88] sm:$0xf0]  ;;  %s2291_s5 = scalar_lea.sflag [#allocation4], %s3428_s10 }
  0x63   : > { %591 = vadd.xlane.f32.xlu1 %v395_v3  ;;  %587 = vadd.xlane.f32.xlu0 %v393_v4  ;;  %v2702_v47 = vld [vmem:[#allocation8 + $0x40] sm:$0xf0]  ;;  %v2476_v50 = vld [vmem:[#allocation8 + $0x18] sm:$0xf]  ;;  %v2697_v52 = vld [vmem:[#allocation8 + $0x1c] sm:$0xf] }
  0x64   : > { %398 = vadd.xlane.f32.xlu2 %v385_v5  ;;  %v414_v10 = vsub.f32 1.0, %v413_v9  ;;  %875 = vmatpush.bf16.msra.mxu3 %v2557_v55  ;;  %v2698_v51 = vld [vmem:[#allocation8 + $0x20] sm:$0xf0]  ;;  %v2478_v55 = vld [vmem:[#allocation8 + $0x24] sm:$0xf0]  ;;  %s3161_s4 = sshra.s32 %s2306_s17, 4  ;;  %s3162_s4 = int_to_ptr.hbm [resolvable:$true] %s3161_s4 }
  0x65   : > { %v2477_v54 = vor.u32 %v2698_v51, %v2476_v50  ;;  %v2484_v56 = vld [vmem:[#allocation8 + $0x20] sm:$0xf]  ;;  %v2699_v57 = vld [vmem:[#allocation8 + $0x28] sm:$0xf0]  ;;  %v2602_v51 = vld [vmem:[#allocation10 + $0x58] sm:$0xf0]  ;;  %p3168_p2 = scmp.lt.s32.totalorder %s3162_s4, %s4215_s6 }
  0x66   : > { %v415_v11 = vmul.f32 %v2878_v8, %v414_v10  ;;  %838 = vmatpush.bf16.msra.mxu0 %v2537_v59  ;;  %857 = vmatpush.bf16.msra.mxu1 %v2541_v63  ;;  %v2512_v10 = vld [vmem:[#allocation8 + $0x60] sm:$0xf]  ;;  %v2481_v59 = vor.u32 %v2697_v52, %v2478_v55  ;;  %v2485_v60 = vor.u32 %v2699_v57, %v2484_v56  ;;  %v2695_v63 = vld [vmem:[#allocation8 + $0x8] sm:$0xf0]  ;;  %s3163_s26 = scalar_lea.hbm %s3162_s4, 32  ;;  %s3167_s30 = scalar_lea.hbm %s4215_s6, 128 }
  0x67   : > { %p3164_p1 = scmp.ne.s32.totalorder %s3162_s4, %s3163_s26  ;;  %p3169_p9 = scmp.lt.s32.totalorder %s3167_s30, %s3163_s26 }
  0x68   : > { %v416_v12 = vadd.f32 %v2878_v8, %v415_v11  ;;  %v2707_v11 = vld [vmem:[#allocation8 + $0x68] sm:$0xf0] }
  0x69   : > { %p3165_p4 = pnand %p3164_p1, %p3371_p3  ;;  %p3170_p7 = por %p3169_p9, %p3168_p2 }
  0x6a   : > { %v3461_v13 = vsel %vm417_vm0, %v2878_v8, %v416_v12  ;;  %v2706_v12 = vld [vmem:[#allocation8 + $0x64] sm:$0xf] }
  0x6b   : > { %p3166_p8 = pneg %p3165_p4 }
  0x6c   : > { %400 = vadd.xlane.f32.xlu2 %v386_v6 }
  0x6d   : > { %p3171_p10 = pnand %p3170_p7, %p3166_p8 }
  0xce   : > { %v590_v14 = vpop.xlane.xlu1 %589  ;;  %v586_v15 = vpop.xlane.xlu0 %585 }
  0xcf   : > { %v593_v16 = vmul.f32 %v586_v15, %v3461_v13  ;;  %v397_v18 = vpop.xlane.xlu2 %396  ;;  %v595_v24 = vmul.f32 %v590_v14, %v3461_v13  ;;  %v2513_v14 = vor.u32 %v2707_v11, %v2512_v10  ;;  %v2514_v15 = vld [vmem:[#allocation8 + $0x6c] sm:$0xf0] }
  0xd0   : > { %v419_v28 = vmul.f32 %v3461_v13, %v397_v18  ;;  %v2708_v18 = vld [vmem:[#allocation8 + $0x70] sm:$0xf0] }
  0xd1   : > { %v3464_v17 = vsub.f32 %v392_v1, %v593_v16  ;;  %v3483_v32 = vsub.f32 %v394_v0, %v595_v24  ;;  %v2545_v0 = vor.u32 %v2714_v62, %v2544_v61  ;;  %v2524_v1 = vld [vmem:[#allocation8 + $0x78] sm:$0xf]  ;;  %v2520_v16 = vld [vmem:[#allocation8 + $0x68] sm:$0xf]  ;;  %v2464_v62 = vld [vmem:[#allocation8] sm:$0xf] }
  0xd2   : > { %v3486_v33 = vsub.f32 %v384_v2, %v419_v28  ;;  %v2710_v2 = vld [vmem:[#allocation8 + $0x80] sm:$0xf0]  ;;  %v2502_v28 = vld [vmem:[#allocation8 + $0x54] sm:$0xf0] }
  0xd3   : > { %v601_v19 = vmul.f32 %v3464_v17, %v3464_v17  ;;  %v603_v34 = vmul.f32 %v3483_v32, %v3483_v32  ;;  %876 = vmatpush.bf16.msra.mxu3 %v2545_v0  ;;  %v2465_v0 = vor.u32 %v2695_v63, %v2464_v62 }
  0xd4   : > { %v435_v37 = vmul.f32 %v3486_v33, %v3486_v33 }
  0xd5   : > { %605 = vadd.xlane.f32.xlu0 %v601_v19  ;;  %v2517_v19 = vor.u32 %v2706_v12, %v2514_v15 }
  0xd6   : > { %v592_v20 = vpop.xlane.xlu1 %591  ;;  %v588_v21 = vpop.xlane.xlu0 %587 }
  0xd7   : > { %v596_v22 = vmul.f32 %v592_v20, %v3461_v13  ;;  %v594_v23 = vmul.f32 %v588_v21, %v3461_v13  ;;  %v399_v31 = vpop.xlane.xlu2 %398  ;;  %v2521_v20 = vor.u32 %v2708_v18, %v2520_v16  ;;  %v2500_v21 = vld [vmem:[#allocation8 + $0x48] sm:$0xf] }
  0xd8   : > { %v420_v35 = vmul.f32 %v3461_v13, %v399_v31 }
  0xd9   : > { %v3471_v25 = vsub.f32 %v395_v3, %v596_v22  ;;  %v3473_v26 = vsub.f32 %v393_v4, %v594_v23  ;;  %v2709_v3 = vld [vmem:[#allocation8 + $0x7c] sm:$0xf]  ;;  %v2525_v4 = vor.u32 %v2710_v2, %v2524_v1  ;;  %v2704_v22 = vld [vmem:[#allocation8 + $0x50] sm:$0xf0]  ;;  %v2703_v23 = vld [vmem:[#allocation8 + $0x4c] sm:$0xf] }
  0xda   : > { %v3497_v38 = vsub.f32 %v385_v5, %v420_v35  ;;  %v2526_v5 = vld [vmem:[#allocation8 + $0x84] sm:$0xf0]  ;;  %v2501_v24 = vor.u32 %v2704_v22, %v2500_v21  ;;  %v2505_v31 = vor.u32 %v2703_v23, %v2502_v28  ;;  %v2488_v35 = vld [vmem:[#allocation8 + $0x30] sm:$0xf]  ;;  %v2694_v1 = vld [vmem:[#allocation8 + $0x4] sm:$0xf] }
  0xdb   : > { %v602_v29 = vmul.f32 %v3473_v26, %v3473_v26  ;;  %v604_v30 = vmul.f32 %v3471_v25, %v3471_v25  ;;  %v2529_v8 = vor.u32 %v2709_v3, %v2526_v5  ;;  %839 = vmatpush.bf16.msra.mxu0 %v2525_v4  ;;  %v2466_v2 = vld [vmem:[#allocation8 + $0xc] sm:$0xf0]  ;;  %v2472_v3 = vld [vmem:[#allocation8 + $0x8] sm:$0xf]  ;;  %v2696_v5 = vld [vmem:[#allocation8 + $0x10] sm:$0xf0] }
  0xdc   : > { %v436_v40 = vmul.f32 %v3497_v38, %v3497_v38  ;;  %v2469_v4 = vor.u32 %v2694_v1, %v2466_v2  ;;  %v2592_v1 = vld [vmem:[#allocation10 + $0x40] sm:$0xf]  ;;  %v2727_v2 = vld [vmem:[#allocation10 + $0x44] sm:$0xf0] }
  0xdd   : > { %607 = vadd.xlane.f32.xlu1 %v602_v29  ;;  %402 = vadd.xlane.f32.xlu0 %v3476_v27  ;;  %v2508_v29 = vld [vmem:[#allocation8 + $0x50] sm:$0xf] }
  0xde   : > { %611 = vadd.xlane.f32.xlu2 %v604_v30  ;;  %858 = vmatpush.bf16.msra.mxu1 %v2529_v8  ;;  %v2705_v30 = vld [vmem:[#allocation8 + $0x58] sm:$0xf0]  ;;  %v2733_v8 = vld [vmem:[#allocation10 + $0x74] sm:$0xf0] }
  0xdf   : > { %v401_v39 = vpop.xlane.xlu2 %400  ;;  %840 = vmatpush.bf16.msra.mxu0 %v2513_v14  ;;  %v2618_v14 = vld [vmem:[#allocation10 + $0x78] sm:$0xf0] }
  0xe0   : > { %v421_v41 = vmul.f32 %v3461_v13, %v401_v39  ;;  %v2700_v39 = vld [vmem:[#allocation8 + $0x34] sm:$0xf] }
  0xe2   : > { %v3506_v43 = vsub.f32 %v386_v6, %v421_v41  ;;  %v2532_v6 = vld [vmem:[#allocation8 + $0x80] sm:$0xf]  ;;  %859 = vmatpush.bf16.msra.mxu1 %v2517_v19 }
  0xe3   : > { %v2533_v9 = vor.u32 %v2711_v7, %v2532_v6  ;;  %841 = vmatpush.bf16.msra.mxu0 %v2501_v24  ;;  %v2490_v41 = vld [vmem:[#allocation8 + $0x3c] sm:$0xf0]  ;;  %v2473_v6 = vor.u32 %v2696_v5, %v2472_v3  ;;  %v2616_v7 = vld [vmem:[#allocation10 + $0x70] sm:$0xf] }
  0xe4   : > { %v437_v44 = vmul.f32 %v3506_v43, %v3506_v43  ;;  %v2493_v48 = vor.u32 %v2700_v39, %v2490_v41  ;;  %v2617_v12 = vor.u32 %v2733_v8, %v2616_v7  ;;  %v2608_v24 = vld [vmem:[#allocation10 + $0x60] sm:$0xf]  ;;  %v2729_v41 = vld [vmem:[#allocation10 + $0x54] sm:$0xf0]  ;;  %v3570_v8 = vld [vmem:[#allocation7] sm:$0xf] }
  0xe5   : > { %609 = vadd.xlane.f32.xlu1 %v603_v34  ;;  %404 = vadd.xlane.f32.xlu0 %v3492_v36  ;;  %v2509_v34 = vor.u32 %v2705_v30, %v2508_v29  ;;  %v2731_v30 = vld [vmem:[#allocation10 + $0x64] sm:$0xf0] }
  0xe6   : > { %443 = vadd.xlane.f32.xlu2 %v435_v37  ;;  %877 = vmatpush.bf16.msra.mxu3 %v2533_v9  ;;  %v2701_v37 = vld [vmem:[#allocation8 + $0x38] sm:$0xf0]  ;;  %v2732_v9 = vld [vmem:[#allocation10 + $0x74] sm:$0xf] }
  0xe7   : > { %860 = vmatpush.bf16.msra.mxu1 %v2505_v31  ;;  %v2621_v19 = vor.u32 %v2732_v9, %v2618_v14  ;;  %v2730_v31 = vld [vmem:[#allocation10 + $0x64] sm:$0xf]  ;;  %v2593_v9 = vor.u32 %v2727_v2, %v2592_v1 }
  0xea   : > { %878 = vmatpush.bf16.msra.mxu3 %v2521_v20 }
  0xeb   : > { %861 = vmatpush.bf16.msra.mxu1 %v2493_v48 }
  0xed   : > { %406 = vadd.xlane.f32.xlu1 %v3503_v42  ;;  %445 = vadd.xlane.f32.xlu0 %v436_v40  ;;  %v2489_v40 = vor.u32 %v2701_v37, %v2488_v35  ;;  %v2609_v35 = vor.u32 %v2731_v30, %v2608_v24  ;;  %v2610_v37 = vld [vmem:[#allocation10 + $0x68] sm:$0xf0]  ;;  %v2586_v24 = vld [vmem:[#allocation10 + $0x38] sm:$0xf0] }
  0xee   : > { %879 = vmatpush.bf16.msra.mxu3 %v2509_v34 }
  0xef   : > { %842 = vmatpush.bf16.msra.mxu0 %v2489_v40  ;;  %862 = vmatpush.bf16.msra.mxu1 %v2481_v59  ;;  %v2600_v40 = vld [vmem:[#allocation10 + $0x50] sm:$0xf] }
  0xf0   : > { %v2601_v50 = vor.u32 %v2729_v41, %v2600_v40 }
  0xf3   : > { %843 = vmatpush.bf16.msra.mxu0 %v2477_v54  ;;  %863 = vmatpush.bf16.msra.mxu1 %v2469_v4  ;;  %v2594_v4 = vld [vmem:[#allocation10 + $0x48] sm:$0xf0] }
  0xf5   : > { %408 = vadd.xlane.f32.xlu0 %v3511_v45  ;;  %447 = vadd.xlane.f32.xlu1 %v437_v44  ;;  %v2496_v44 = vld [vmem:[#allocation8 + $0x38] sm:$0xf] }
  0xf6   : > { %v2497_v49 = vor.u32 %v2702_v47, %v2496_v44  ;;  %v2728_v44 = vld [vmem:[#allocation10 + $0x54] sm:$0xf] }
  0xf7   : > { %844 = vmatpush.bf16.msra.mxu0 %v2465_v0  ;;  %v2605_v55 = vor.u32 %v2728_v44, %v2602_v51  ;;  %v2722_v44 = vld [vmem:[#allocation10 + $0x24] sm:$0xf] }
  0xf8   : > { %880 = vmatpush.bf16.msra.mxu3 %v2497_v49 }
  0xfb   : > { %1019 = vmatpush.bf16.msrb.mxu0 %v2621_v19 }
  0xfc   : > { %881 = vmatpush.bf16.msra.mxu3 %v2485_v60 }
  0xfd   : > { %410 = vadd.xlane.f32.xlu1 %v3515_v46 }
 0x100   : > { %882 = vmatpush.bf16.msra.mxu3 %v2473_v6 }
 0x104   : > { %990 = vmatpush.bf16.msrb.mxu3 %v2617_v12  ;;  %v2724_v12 = vld [vmem:[#allocation10 + $0x34] sm:$0xf] }
 0x108   : > { %991 = vmatpush.bf16.msrb.mxu3 %v2609_v35 }
 0x10c   : > { %992 = vmatpush.bf16.msrb.mxu3 %v2601_v50 }
 0x110   : > { %993 = vmatpush.bf16.msrb.mxu3 %v2593_v9 }
 0x148   : > { %v606_v53 = vpop.xlane.xlu0 %605 }
 0x149   : > { %v613_v58 = vmul.f32 %v606_v53, %v3461_v13 }
 0x14b   : > { %v3519_v61 = vadd.f32 1e-05, %v613_v58 }
 0x14d   : > { %2879 = vrsqrt.f32 %v3519_v61  ;;  %vm627_vm2 = vweird.f32 %v3519_v61 }
 0x150   : > { %v608_v10 = vpop.xlane.xlu1 %607  ;;  %v403_v11 = vpop.xlane.xlu0 %402 }
 0x151   : > { %v614_v15 = vmul.f32 %v608_v10, %v3461_v13  ;;  %v422_v16 = vmul.f32 %v3461_v13, %v403_v11  ;;  %v612_v18 = vpop.xlane.xlu2 %611  ;;  %v2584_v10 = vld [vmem:[#allocation10 + $0x30] sm:$0xf]  ;;  %v2725_v11 = vld [vmem:[#allocation10 + $0x34] sm:$0xf0] }
 0x152   : > { %v616_v20 = vmul.f32 %v612_v18, %v3461_v13 }
 0x153   : > { %v3525_v21 = vpop.eup %2879  ;;  %v3527_v22 = vadd.f32 1e-05, %v614_v15  ;;  %v3530_v23 = vsub.f32 %v3476_v27, %v422_v16  ;;  %v2613_v27 = vor.u32 %v2730_v31, %v2610_v37  ;;  %v3581_v31 = vperm.slane %v3570_v8, 2  ;;  %v2576_v37 = vld [vmem:[#allocation10 + $0x20] sm:$0xf] }
 0x154   : > { %v622_v28 = vmul.f32 %v3525_v21, %v3519_v61  ;;  %v3534_v29 = vadd.f32 1e-05, %v616_v20  ;;  %vm628_vm1 = vweird.f32 %v3525_v21 }
 0x155   : > { %2881 = vrsqrt.f32 %v3527_v22  ;;  %v438_v34 = vmul.f32 %v3530_v23, %v3530_v23  ;;  %1020 = vmatpush.bf16.msrb.mxu0 %v2613_v27  ;;  %vm3563_vm3 = vmor %vm627_vm2, %vm628_vm1  ;;  %vm637_vm4 = vweird.f32 %v3527_v22 }
 0x156   : > { %v623_v39 = vmul.f32 %v3525_v21, %v622_v28  ;;  %2883 = vrsqrt.f32 %v3534_v29  ;;  %vm657_vm7 = vweird.f32 %v3534_v29 }
 0x157   : > { %449 = vadd.xlane.f32.xlu2 %v438_v34  ;;  %v2585_v34 = vor.u32 %v2725_v11, %v2584_v10  ;;  %v2560_v10 = vld [vmem:[#allocation10] sm:$0xf] }
 0x158   : > { %v624_v47 = vmul.f32 0.5, %v623_v39  ;;  %v610_v48 = vpop.xlane.xlu1 %609  ;;  %v405_v49 = vpop.xlane.xlu0 %404  ;;  %v2723_v39 = vld [vmem:[#allocation10 + $0x24] sm:$0xf0] }
 0x159   : > { %v615_v52 = vmul.f32 %v610_v48, %v3461_v13  ;;  %v423_v53 = vmul.f32 %v3461_v13, %v405_v49  ;;  %v444_v54 = vpop.xlane.xlu2 %443  ;;  %1021 = vmatpush.bf16.msrb.mxu0 %v2605_v55  ;;  %994 = vmatpush.bf16.msrb.mxu3 %v2585_v34  ;;  %v2568_v55 = vld [vmem:[#allocation10 + $0x10] sm:$0xf] }
 0x15a   : > { %v625_v56 = vsub.f32 1.5, %v624_v47  ;;  %v459_v57 = vmul.f32 %v444_v54, %v3461_v13  ;;  %v2578_v47 = vld [vmem:[#allocation10 + $0x28] sm:$0xf0] }
 0x15b   : > { %v3544_v58 = vpop.eup %2881  ;;  %v3547_v59 = vadd.f32 1e-05, %v615_v52  ;;  %v3550_v60 = vsub.f32 %v3492_v36, %v423_v53  ;;  %v2726_v36 = vld [vmem:[#allocation10 + $0x44] sm:$0xf]  ;;  %v2581_v54 = vor.u32 %v2722_v44, %v2578_v47 }
 0x15c   : > { %v3552_v62 = vpop.eup %2883  ;;  %v626_v63 = vmul.f32 %v3525_v21, %v625_v56  ;;  %v632_v0 = vmul.f32 %v3544_v58, %v3527_v22  ;;  %v3568_v7 = vadd.f32 1e-05, %v459_v57  ;;  %v2597_v20 = vor.u32 %v2726_v36, %v2594_v4  ;;  %v2721_v56 = vld [vmem:[#allocation10 + $0x14] sm:$0xf0]  ;;  %v2720_v22 = vld [vmem:[#allocation10 + $0x14] sm:$0xf] }
 0x15d   : > { %v652_v3 = vmul.f32 %v3552_v62, %v3534_v29  ;;  %2885 = vrsqrt.f32 %v3547_v59  ;;  %v439_v61 = vmul.f32 %v3550_v60, %v3550_v60  ;;  %vm638_vm5 = vweird.f32 %v3544_v58 }
 0x15e   : > { %v633_v6 = vmul.f32 %v3544_v58, %v632_v0  ;;  %v630_v14 = vsel %vm3563_vm3, %v3525_v21, %v626_v63  ;;  %1022 = vmatpush.bf16.msrb.mxu0 %v2597_v20  ;;  %v2589_v21 = vor.u32 %v2724_v12, %v2586_v24  ;;  %2887 = vrsqrt.f32 %v3568_v7  ;;  %vm639_vm6 = vmor %vm637_vm4, %vm638_vm5  ;;  %v2570_v63 = vld [vmem:[#allocation10 + $0x18] sm:$0xf0] }
 0x15f   : > { %v653_v16 = vmul.f32 %v3552_v62, %v652_v3  ;;  %451 = vadd.xlane.f32.xlu2 %v439_v61  ;;  %v661_v48 = vmul.f32 %v630_v14, %v3464_v17  ;;  %v3609_v3 = vperm.slane %v3570_v8, 3  ;;  %vm658_vm8 = vweird.f32 %v3552_v62 }
 0x160   : > { %v634_v15 = vmul.f32 0.5, %v633_v6  ;;  %v407_v18 = vpop.xlane.xlu1 %406  ;;  %v446_v19 = vpop.xlane.xlu0 %445  ;;  %v2569_v6 = vor.u32 %v2721_v56, %v2568_v55  ;;  %v2573_v9 = vor.u32 %v2720_v22, %v2570_v63  ;;  %vm647_vm9 = vweird.f32 %v3547_v59  ;;  %vm3631_vm11 = vmor %vm657_vm7, %vm658_vm8 }
 0x161   : > { %v424_v28 = vmul.f32 %v3461_v13, %v407_v18  ;;  %v460_v30 = vmul.f32 %v446_v19, %v3461_v13  ;;  %v654_v51 = vmul.f32 0.5, %v653_v16  ;;  %v2718_v16 = vld [vmem:[#allocation10 + $0x4] sm:$0xf]  ;;  %v2562_v18 = vld [vmem:[#allocation10 + $0x8] sm:$0xf0]  ;;  %vm481_vm15 = vweird.f32 %v3568_v7 }
 0x162   : > { %v635_v35 = vsub.f32 1.5, %v634_v15  ;;  %1023 = vmatpush.bf16.msrb.mxu0 %v2589_v21  ;;  %v2719_v15 = vld [vmem:[#allocation10 + $0x4] sm:$0xf0]  ;;  %v3666_v22 = vperm.slane %v3570_v8, 0 }
 0x163   : > { %v3585_v27 = vpop.eup %2885  ;;  %v3588_v40 = vsub.f32 %v3503_v42, %v424_v28  ;;  %v3590_v41 = vadd.f32 1e-05, %v460_v30  ;;  %v2577_v42 = vor.u32 %v2723_v39, %v2576_v37  ;;  %v655_v36 = vsub.f32 1.5, %v654_v51 }
 0x164   : > { %v636_v49 = vmul.f32 %v3544_v58, %v635_v35  ;;  %v642_v50 = vmul.f32 %v3585_v27, %v3547_v59  ;;  %vm648_vm10 = vweird.f32 %v3585_v27  ;;  %v2561_v21 = vor.u32 %v2719_v15, %v2560_v10 }
 0x165   : > { %2889 = vrsqrt.f32 %v3590_v41  ;;  %v440_v17 = vmul.f32 %v3588_v40, %v3588_v40  ;;  %995 = vmatpush.bf16.msrb.mxu3 %v2577_v42  ;;  %v656_v28 = vmul.f32 %v3552_v62, %v655_v36  ;;  %vm649_vm12 = vmor %vm647_vm9, %vm648_vm10  ;;  %v2565_v37 = vor.u32 %v2718_v16, %v2562_v18 }
 0x166   : > { %v640_v52 = vsel %vm639_vm6, %v3544_v58, %v636_v49  ;;  %v643_v53 = vmul.f32 %v3585_v27, %v642_v50  ;;  %v666_v58 = vmul.f32 %v3581_v31, %v661_v48  ;;  %1024 = vmatpush.bf16.msrb.mxu0 %v2581_v54  ;;  %vm491_vm13 = vweird.f32 %v3590_v41 }
 0x167   : > { %v662_v57 = vmul.f32 %v640_v52, %v3473_v26  ;;  %453 = vadd.xlane.f32.xlu0 %v440_v17  ;;  %v3613_v26 = vpop.eup %2887  ;;  %v660_v47 = vsel %vm3631_vm11, %v3552_v62, %v656_v28 }
 0x168   : > { %v644_v0 = vmul.f32 0.5, %v643_v53  ;;  %v409_v1 = vpop.xlane.xlu0 %408  ;;  %v3605_v2 = vpop.xlane.xlu1 %447  ;;  %v671_v24 = vadd.f32 %v3609_v3, %v666_v58  ;;  %v476_v30 = vmul.f32 %v3613_v26, %v3568_v7  ;;  %v664_v51 = vmul.f32 %v660_v47, %v3471_v25 }
 0x169   : > { %v425_v4 = vmul.f32 %v3461_v13, %v409_v1  ;;  %v667_v5 = vmul.f32 %v3581_v31, %v662_v57  ;;  %996 = vmatpush.bf16.msrb.mxu3 %v2569_v6  ;;  %vm482_vm0 = vweird.f32 %v3613_v26 }
 0x16a   : > { %v645_v61 = vsub.f32 1.5, %v644_v0  ;;  %1025 = vmatpush.bf16.msrb.mxu0 %v2573_v9  ;;  %v477_v48 = vmul.f32 %v3613_v26, %v476_v30  ;;  %v669_v17 = vmul.f32 %v3581_v31, %v664_v51  ;;  %vm483_vm2 = vmor %vm481_vm15, %vm482_vm0  ;;  %v3670_v0 = vperm.slane %v3570_v8, 1 }
 0x16b   : > { %v2890_v11 = vpop.eup %2889  ;;  %v3620_v12 = vsub.f32 %v3511_v45, %v425_v4  ;;  %v672_v14 = vadd.f32 %v3609_v3, %v667_v5  ;;  %vm1084_vm15 = vcmask 261120  }
 0x16c   : > { %v646_v19 = vmul.f32 %v3585_v27, %v645_v61  ;;  %v486_v20 = vmul.f32 %v2890_v11, %v3590_v41  ;;  %v478_v42 = vmul.f32 0.5, %v477_v48  ;;  %vm492_vm14 = vweird.f32 %v2890_v11 }
 0x16d   : > { %v441_v34 = vmul.f32 %v3620_v12, %v3620_v12  ;;  %v675_v35 = vpack.c.bf16 %v672_v14, %v671_v24  ;;  %997 = vmatpush.bf16.msrb.mxu3 %v2561_v21  ;;  %vm493_vm1 = vmor %vm491_vm13, %vm492_vm14 }
 0x16e   : > { %v650_v29 = vsel %vm649_vm12, %v3585_v27, %v646_v19  ;;  %v487_v39 = vmul.f32 %v2890_v11, %v486_v20  ;;  %1026 = vmatpush.bf16.msrb.mxu0 %v2565_v37  ;;  %v479_v54 = vsub.f32 1.5, %v478_v42 }
 0x16f   : > { %455 = vadd.xlane.f32.xlu1 %v441_v34  ;;  %845 = vmatmul.bf16.vlgmr.msra.gmra.mxu0 %v675_v35  ;;  %v663_v49 = vmul.f32 %v650_v29, %v3483_v32 }
 0x170   : > { %864 = vmatmul.bf16.vlgmr.msra.gmra.mxu1 %v675_v35  ;;  %v411_v44 = vpop.xlane.xlu1 %410  ;;  %883 = vmatmul.bf16.vlgmr.msra.gmra.mxu3 %v675_v35  ;;  %v488_v50 = vmul.f32 0.5, %v487_v39  ;;  %v480_v55 = vmul.f32 %v3613_v26, %v479_v54 }
 0x171   : > { %v426_v59 = vmul.f32 %v3461_v13, %v411_v44  ;;  %v668_v62 = vmul.f32 %v3581_v31, %v663_v49 }
 0x172   : > { %v489_v53 = vsub.f32 1.5, %v488_v50  ;;  %v484_v31 = vsel %vm483_vm2, %v3613_v26, %v480_v55 }
 0x173   : > { %v3649_v27 = vsub.f32 %v3515_v46, %v426_v59  ;;  %v673_v32 = vadd.f32 %v3609_v3, %v668_v62  ;;  %v674_v46 = vadd.f32 %v3609_v3, %v669_v17  ;;  %v555_v7 = vmul.f32 %v484_v31, %v3486_v33 }
 0x174   : > { %v490_v25 = vmul.f32 %v2890_v11, %v489_v53  ;;  %v461_v33 = vmul.f32 %v3605_v2, %v3461_v13 }
 0x175   : > { %v442_v52 = vmul.f32 %v3649_v27, %v3649_v27  ;;  %v676_v56 = vpack.c.bf16 %v674_v46, %v673_v32  ;;  %v564_v1 = vmul.f32 %v3666_v22, %v555_v7 }
 0x176   : > { %v494_v57 = vsel %vm493_vm1, %v2890_v11, %v490_v25 }
 0x177   : > { %457 = vadd.xlane.f32.xlu2 %v442_v52  ;;  %v556_v41 = vmul.f32 %v494_v57, %v3497_v38  ;;  %v573_v3 = vadd.f32 %v3670_v0, %v564_v1  ;;  %v469_v38 = vadd.f32 1e-05, %v461_v33 }
 0x179   : > { %v565_v63 = vmul.f32 %v3666_v22, %v556_v41  ;;  %2891 = vrsqrt.f32 %v469_v38  ;;  %vm501_vm3 = vweird.f32 %v469_v38 }
 0x17b   : > { %v574_v58 = vadd.f32 %v3670_v0, %v565_v63 }
 0x17d   : > { %v581_v36 = vpack.c.bf16 %v574_v58, %v573_v3 }
 0x17f   : > { %850 = vmatmul.bf16.gmra.mxu0 %v676_v56  ;;  %v2892_v4 = vpop.eup %2891 }
 0x180   : > { %869 = vmatmul.bf16.gmra.mxu1 %v676_v56  ;;  %888 = vmatmul.bf16.gmra.mxu3 %v676_v56  ;;  %v496_v5 = vmul.f32 %v2892_v4, %v469_v38  ;;  %vm502_vm4 = vweird.f32 %v2892_v4 }
 0x181   : > { %vm503_vm5 = vmor %vm501_vm3, %vm502_vm4 }
 0x182   : > { %v497_v6 = vmul.f32 %v2892_v4, %v496_v5 }
 0x184   : > { %v498_v9 = vmul.f32 0.5, %v497_v6 }
 0x186   : > { %v499_v10 = vsub.f32 1.5, %v498_v9 }
 0x188   : > { %v500_v16 = vmul.f32 %v2892_v4, %v499_v10 }
 0x18a   : > { %v504_v24 = vsel %vm503_vm5, %v2892_v4, %v500_v16 }
 0x18b   : > { %v557_v34 = vmul.f32 %v504_v24, %v3506_v43 }
 0x18d   : > { %v566_v44 = vmul.f32 %v3666_v22, %v557_v34 }
 0x18f   : > { %1027 = vmatmul.bf16.vlgmr.msrb.gmra.mxu0 %v581_v36  ;;  %v575_v42 = vadd.f32 %v3670_v0, %v566_v44 }
 0x190   : > { %998 = vmatmul.bf16.vlgmr.msrb.gmra.mxu3 %v581_v36 }
 0x1ca   : > { %v450_v26 = vpop.xlane.xlu2 %449 }
 0x1cb   : > { %v462_v8 = vmul.f32 %v450_v26, %v3461_v13 }
 0x1cd   : > { %v470_v61 = vadd.f32 1e-05, %v462_v8 }
 0x1cf   : > { %2893 = vrsqrt.f32 %v470_v61  ;;  %vm511_vm7 = vweird.f32 %v470_v61 }
 0x1d2   : > { %v452_v11 = vpop.xlane.xlu2 %451 }
 0x1d3   : > { %v463_v15 = vmul.f32 %v452_v11, %v3461_v13 }
 0x1d5   : > { %v2894_v14 = vpop.eup %2893  ;;  %v471_v18 = vadd.f32 1e-05, %v463_v15 }
 0x1d6   : > { %v506_v2 = vmul.f32 %v2894_v14, %v470_v61  ;;  %vm512_vm6 = vweird.f32 %v2894_v14 }
 0x1d7   : > { %2895 = vrsqrt.f32 %v471_v18  ;;  %vm513_vm8 = vmor %vm511_vm7, %vm512_vm6  ;;  %vm521_vm9 = vweird.f32 %v471_v18  ;;  %vm1254_vm6 = vcmask 1043456   ;;  %vm1197_vm7 = vcmask 195584  }
 0x1d8   : > { %v507_v19 = vmul.f32 %v2894_v14, %v506_v2 }
 0x1da   : > { %v508_v20 = vmul.f32 0.5, %v507_v19  ;;  %v454_v28 = vpop.xlane.xlu0 %453 }
 0x1db   : > { %v464_v30 = vmul.f32 %v454_v28, %v3461_v13 }
 0x1dc   : > { %v509_v45 = vsub.f32 1.5, %v508_v20 }
 0x1dd   : > { %v472_v21 = vadd.f32 1e-05, %v464_v30  ;;  %v2896_v37 = vpop.eup %2895 }
 0x1de   : > { %v510_v35 = vmul.f32 %v2894_v14, %v509_v45  ;;  %v516_v29 = vmul.f32 %v2896_v37, %v471_v18  ;;  %vm522_vm10 = vweird.f32 %v2896_v37 }
 0x1df   : > { %2897 = vrsqrt.f32 %v472_v21  ;;  %vm3687_vm11 = vmor %vm521_vm9, %vm522_vm10  ;;  %vm531_vm12 = vweird.f32 %v472_v21  ;;  %vm2196_vm9 = vcmask 785408  }
 0x1e0   : > { %v514_v39 = vsel %vm513_vm8, %v2894_v14, %v510_v35  ;;  %v517_v47 = vmul.f32 %v2896_v37, %v516_v29  ;;  %vm2191_vm8 = vcmask 523264  }
 0x1e1   : > { %v558_v59 = vmul.f32 %v514_v39, %v3530_v23 }
 0x1e2   : > { %v456_v48 = vpop.xlane.xlu1 %455  ;;  %v518_v50 = vmul.f32 0.5, %v517_v47 }
 0x1e3   : > { %v465_v49 = vmul.f32 %v456_v48, %v3461_v13  ;;  %v567_v51 = vmul.f32 %v3666_v22, %v558_v59 }
 0x1e4   : > { %v519_v62 = vsub.f32 1.5, %v518_v50 }
 0x1e5   : > { %v473_v43 = vadd.f32 1e-05, %v465_v49  ;;  %v2898_v52 = vpop.eup %2897  ;;  %v576_v53 = vadd.f32 %v3670_v0, %v567_v51 }
 0x1e6   : > { %v526_v17 = vmul.f32 %v2898_v52, %v472_v21  ;;  %v520_v54 = vmul.f32 %v2896_v37, %v519_v62  ;;  %vm532_vm13 = vweird.f32 %v2898_v52 }
 0x1e7   : > { %2899 = vrsqrt.f32 %v473_v43  ;;  %v582_v32 = vpack.c.bf16 %v576_v53, %v575_v42  ;;  %vm533_vm14 = vmor %vm531_vm12, %vm532_vm13  ;;  %vm541_vm0 = vweird.f32 %v473_v43 }
 0x1e8   : > { %v527_v25 = vmul.f32 %v2898_v52, %v526_v17  ;;  %v524_v57 = vsel %vm3687_vm11, %v2896_v37, %v520_v54 }
 0x1e9   : > { %1003 = vmatmul.bf16.gmra.mxu3 %v582_v32  ;;  %1032 = vmatmul.bf16.gmra.mxu0 %v582_v32  ;;  %v559_v36 = vmul.f32 %v524_v57, %v3550_v60 }
 0x1ea   : > { %v458_v46 = vpop.xlane.xlu2 %457  ;;  %v528_v55 = vmul.f32 0.5, %v527_v25 }
 0x1eb   : > { %v466_v56 = vmul.f32 %v458_v46, %v3461_v13  ;;  %v568_v26 = vmul.f32 %v3666_v22, %v559_v36 }
 0x1ec   : > { %v529_v41 = vsub.f32 1.5, %v528_v55 }
 0x1ed   : > { %v2900_v31 = vpop.eup %2899  ;;  %v474_v7 = vadd.f32 1e-05, %v466_v56  ;;  %v865_v63 = vpop.f32.mrf.mxu1  ;;  %v577_v2 = vadd.f32 %v3670_v0, %v568_v26 }
 0x1ee   : > { %v536_v1 = vmul.f32 %v2900_v31, %v473_v43  ;;  %v1054_v58 = vpack.c.bf16 %v865_v63, %v865_v63  ;;  %v530_v3 = vmul.f32 %v2898_v52, %v529_v41  ;;  %vm542_vm1 = vweird.f32 %v2900_v31 }
 0x1ef   : > { %2901 = vrsqrt.f32 %v474_v7  ;;  %vm3706_vm2 = vmor %vm541_vm0, %vm542_vm1  ;;  %vm551_vm3 = vweird.f32 %v474_v7 }
 0x1f0   : > { %v537_v33 = vmul.f32 %v2900_v31, %v536_v1  ;;  %v1081_v38 = vunpack.c.l.b16 %v1054_v58  ;;  %v534_v13 = vsel %vm533_vm14, %v2898_v52, %v530_v3 }
 0x1f1   : > { %v560_v6 = vmul.f32 %v534_v13, %v3588_v40 }
 0x1f2   : > { %v538_v4 = vmul.f32 0.5, %v537_v33  ;;  %v3695_v5 = vpack.c.b16 %v1081_v38, %v1081_v38 }
 0x1f3   : > { %v3699_v61 = vpop.f32.mrf.mxu3  ;;  %v569_v9 = vmul.f32 %v3666_v22, %v560_v6 }
 0x1f4   : > { %v539_v8 = vsub.f32 1.5, %v538_v4  ;;  %1366 = vrot.lane.b32.xlu2 %v3695_v5, %s3242_s27  ;;  %v1092_v60 = vsel %vm1084_vm15, %v3695_v5, 0 }
 0x1f5   : > { %v2902_v10 = vpop.eup %2901  ;;  %v867_v11 = vpop.f32.mrf.mxu1  ;;  %1100 = vmatpush.bf16.xpose.msrb.mxu1 %v1092_v60  ;;  %v578_v18 = vadd.f32 %v3670_v0, %v569_v9 }
 0x1f6   : > { %v540_v40 = vmul.f32 %v2900_v31, %v539_v8  ;;  %v546_v14 = vmul.f32 %v2902_v10, %v474_v7  ;;  %v1057_v16 = vpack.c.bf16 %v867_v11, %v867_v11  ;;  %vm552_vm4 = vweird.f32 %v2902_v10 }
 0x1f7   : > { %v583_v24 = vpack.c.bf16 %v578_v18, %v577_v2  ;;  %vm553_vm5 = vmor %vm551_vm3, %vm552_vm4 }
 0x1f8   : > { %v547_v19 = vmul.f32 %v2902_v10, %v546_v14  ;;  %v1112_v20 = vunpack.c.l.b16 %v1057_v16  ;;  %v544_v45 = vsel %vm3706_vm2, %v2900_v31, %v540_v40 }
 0x1f9   : > { %1008 = vmatmul.bf16.gmra.mxu3 %v583_v24  ;;  %1037 = vmatmul.bf16.gmra.mxu0 %v583_v24  ;;  %v561_v37 = vmul.f32 %v544_v45, %v3620_v12  ;;  %v846_v12 = vpop.f32.mrf.mxu0 }
 0x1fa   : > { %v548_v28 = vmul.f32 0.5, %v547_v19  ;;  %v3714_v30 = vpack.c.b16 %v1112_v20, %v1112_v20  ;;  %v1048_v31 = vpack.c.bf16 %v846_v12, %v846_v12  ;;  %v1066_v20 = vpack.c.bf16 %v3699_v61, %v3699_v61 }
 0x1fb   : > { %v3716_v35 = vpop.f32.mrf.mxu3  ;;  %v570_v47 = vmul.f32 %v3666_v22, %v561_v37 }
 0x1fc   : > { %v549_v34 = vsub.f32 1.5, %v548_v28  ;;  %v1122_v21 = vsel %vm1084_vm15, %v3714_v30, 0  ;;  %v1360_v16 = vunpack.c.l.b16 %v1048_v31  ;;  %v1247_v28 = vunpack.c.l.b16 %v1066_v20 }
 0x1fd   : > { %1130 = vmatpush.bf16.xpose.msra.mxu2 %v1122_v21  ;;  %v579_v49 = vadd.f32 %v3670_v0, %v570_v47  ;;  %v870_v52 = vpop.f32.mrf.mxu1 }
 0x1fe   : > { %v550_v29 = vmul.f32 %v2902_v10, %v549_v34  ;;  %v1060_v62 = vpack.c.bf16 %v870_v52, %v870_v52  ;;  %v3765_v19 = vpack.c.b16 %v1360_v16, %v1360_v16  ;;  %v3774_v47 = vpack.c.b16 %v1247_v28, %v1247_v28 }
 0x200   : > { %v554_v39 = vsel %vm553_vm5, %v2902_v10, %v550_v29  ;;  %v1142_v53 = vunpack.c.l.b16 %v1060_v62 }
 0x201   : > { %v562_v44 = vmul.f32 %v554_v39, %v3649_v27 }
 0x202   : > { %v3730_v25 = vpack.c.b16 %v1142_v53, %v1142_v53 }
 0x203   : > { %v571_v48 = vmul.f32 %v3666_v22, %v562_v44  ;;  %v3724_v59 = vpop.f32.mrf.mxu3  ;;  %v848_v22 = vpop.f32.mrf.mxu0 }
 0x204   : > { %v1049_v46 = vpack.c.bf16 %v848_v22, %v848_v22  ;;  %v1152_v56 = vsel %vm1084_vm15, %v3730_v25, 0 }
 0x205   : > { %v580_v50 = vadd.f32 %v3670_v0, %v571_v48  ;;  %v872_v33 = vpop.f32.mrf.mxu1 }
 0x206   : > { %v1391_v57 = vunpack.c.l.b16 %v1049_v46  ;;  %v1063_v13 = vpack.c.bf16 %v872_v33, %v872_v33 }
 0x207   : > { %v584_v51 = vpack.c.bf16 %v580_v50, %v579_v49 }
 0x208   : > { %v3740_v41 = vpack.c.b16 %v1391_v57, %v1391_v57  ;;  %v1172_v6 = vunpack.c.l.b16 %v1063_v13 }
 0x209   : > { %1013 = vmatmul.bf16.gmra.mxu3 %v584_v51  ;;  %1042 = vmatmul.bf16.gmra.mxu0 %v584_v51 }
 0x20a   : > { %v3753_v11 = vpack.c.b16 %v1172_v6, %v1172_v6 }
 0x20b   : > { %v3728_v43 = vpop.f32.mrf.mxu3  ;;  %v851_v7 = vpop.f32.mrf.mxu0 }
 0x20c   : > { %v1182_v15 = vsel %vm1084_vm15, %v3753_v11, 0  ;;  %v1075_v37 = vpack.c.bf16 %v3728_v43, %v3728_v43  ;;  %v3788_v22 = vpack.c.bf16 %v851_v7, %v851_v7 }
 0x20e   : > { %v1332_v49 = vunpack.c.l.b16 %v1075_v37 }
 0x210   : > { %v3782_v62 = vpack.c.b16 %v1332_v49, %v1332_v49 }
 0x213   : > { %v999_v42 = vpop.f32.mrf.mxu3  ;;  %v3745_v63 = vpop.f32.mrf.mxu0 }
 0x214   : > { %v1052_v27 = vpack.c.bf16 %v999_v42, %v999_v42  ;;  %v1256_v42 = vsel %vm1254_vm6, %v3774_v47, 0 }
 0x216   : > { %v1079_v32 = vunpack.c.l.b16 %v1052_v27 }
 0x21b   : > { %v1001_v17 = vpop.f32.mrf.mxu3  ;;  %v1028_v1 = vpop.f32.mrf.mxu0 }
 0x21c   : > { %v1053_v54 = vpack.c.bf16 %v1001_v17, %v1001_v17  ;;  %v1064_v48 = vpack.c.bf16 %v1028_v1, %v1028_v1  ;;  %v1069_v17 = vpack.c.bf16 %v3716_v35, %v3716_v35  ;;  %v1072_v35 = vpack.c.bf16 %v3724_v59, %v3724_v59 }
 0x21e   : > { %v1080_v23 = vunpack.c.l.b16 %v1053_v54  ;;  %v1245_v43 = vunpack.c.l.b16 %v1064_v48  ;;  %v1304_v6 = vunpack.c.l.b16 %v1072_v35 }
 0x220   : > { %v3732_v0 = vpack.c.b16 %v1080_v23, %v1079_v32 }
 0x222   : > { %1364 = vrot.lane.b32.xlu1 %v3732_v0, %s3242_s27  ;;  %v1089_v55 = vsel %vm1084_vm15, %v3732_v0, 0 }
 0x223   : > { %1101 = vmatpush.bf16.xpose.msrb.mxu1 %v1089_v55  ;;  %v1030_v58 = vpop.f32.mrf.mxu0  ;;  %v1276_v55 = vunpack.c.l.b16 %v1069_v17 }
 0x224   : > { %v1065_v29 = vpack.c.bf16 %v1030_v58, %v1030_v58 }
 0x225   : > { %v3801_v33 = vpack.c.b16 %v1276_v55, %v1276_v55 }
 0x226   : > { %v1246_v50 = vunpack.c.l.b16 %v1065_v29 }
 0x227   : > { %v1284_v59 = vsel %vm1254_vm6, %v3801_v33, 0 }
 0x228   : > { %v3784_v27 = vpack.c.b16 %v1246_v50, %v1245_v43 }
 0x22a   : > { %1393 = vrot.lane.b32.xlu1 %v3740_v41, %s3242_s27  ;;  %2622 = vmatmul.msk.bf16.vlgmr.msrb.gmra.mxu1 %vm1084_vm15, %v1048_v31 }
 0x22b   : > { %1160 = vmatpush.bf16.xpose.msra.mxu1 %v1152_v56 }
 0x266   : > { %v3747_v3 = vpop.f32.mrf.mxu0 }
 0x267   : > { %v1067_v13 = vpack.c.bf16 %v3747_v3, %v3747_v3 }
 0x26c   : > { %v1004_v36 = vpop.f32.mrf.mxu3 }
 0x26d   : > { %v1055_v4 = vpack.c.bf16 %v1004_v36, %v1004_v36 }
 0x26e   : > { %v3749_v38 = vpop.f32.mrf.mxu0 }
 0x26f   : > { %v1110_v60 = vunpack.c.l.b16 %v1055_v4  ;;  %v1068_v7 = vpack.c.bf16 %v3749_v38, %v3749_v38  ;;  %v1274_v38 = vunpack.c.l.b16 %v1067_v13 }
 0x274   : > { %v1006_v26 = vpop.f32.mrf.mxu3 }
 0x275   : > { %v1056_v8 = vpack.c.bf16 %v1006_v26, %v1006_v26  ;;  %v1275_v26 = vunpack.c.l.b16 %v1068_v7 }
 0x276   : > { %v3751_v10 = vpop.f32.mrf.mxu0 }
 0x277   : > { %v1111_v9 = vunpack.c.l.b16 %v1056_v8  ;;  %v1070_v3 = vpack.c.bf16 %v3751_v10, %v3751_v10 }
 0x279   : > { %v3755_v40 = vpack.c.b16 %v1111_v9, %v1110_v60  ;;  %v3814_v9 = vpack.c.b16 %v1304_v6, %v1304_v6  ;;  %v1302_v20 = vunpack.c.l.b16 %v1070_v3 }
 0x27b   : > { %1395 = vrot.lane.b32.xlu2 %v3755_v40, %s3242_s27  ;;  %v1119_v14 = vsel %vm1084_vm15, %v3755_v40, 0 }
 0x27c   : > { %1131 = vmatpush.bf16.xpose.msra.mxu2 %v1119_v14  ;;  %v1009_v2 = vpop.f32.mrf.mxu3  ;;  %v3816_v14 = vpack.c.b16 %v1275_v26, %v1274_v38 }
 0x27d   : > { %v1058_v24 = vpack.c.bf16 %v1009_v2, %v1009_v2  ;;  %v1312_v2 = vsel %vm1254_vm6, %v3814_v9, 0 }
 0x27e   : > { %v3763_v18 = vpop.f32.mrf.mxu0 }
 0x27f   : > { %v1140_v39 = vunpack.c.l.b16 %v1058_v24  ;;  %v1071_v60 = vpack.c.bf16 %v3763_v18, %v3763_v18 }
 0x281   : > { %v1303_v16 = vunpack.c.l.b16 %v1071_v60 }
 0x283   : > { %1362 = vrot.lane.b32.xlu2 %v3765_v19, %s3242_s27  ;;  %2623 = vmatmul.msk.bf16.vlgmr.msra.gmra.mxu2 %vm1084_vm15, %v1049_v46  ;;  %v1340_v46 = vsel %vm1254_vm6, %v3782_v62, 0  ;;  %v3826_v18 = vpack.c.b16 %v1303_v16, %v1302_v20 }
 0x284   : > { %1190 = vmatpush.bf16.xpose.msrb.mxu2 %v1182_v15  ;;  %v1011_v45 = vpop.f32.mrf.mxu3  ;;  %v1051_v15 = vpack.c.bf16 %v3745_v63, %v3745_v63 }
 0x285   : > { %v1059_v34 = vpack.c.bf16 %v1011_v45, %v1011_v45 }
 0x286   : > { %v1043_v21 = vpop.f32.mrf.mxu0  ;;  %v1453_v49 = vunpack.c.l.b16 %v1051_v15 }
 0x287   : > { %v1141_v44 = vunpack.c.l.b16 %v1059_v34  ;;  %v1073_v54 = vpack.c.bf16 %v1043_v21, %v1043_v21 }
 0x288   : > { %v3853_v50 = vpack.c.b16 %v1453_v49, %v1453_v49 }
 0x289   : > { %v3776_v61 = vpack.c.b16 %v1141_v44, %v1140_v39  ;;  %v1330_v56 = vunpack.c.l.b16 %v1073_v54  ;;  %v1367_v54 = vpop.permute.xlu2 %1366 }
 0x28a   : > { %v1375_v55 = vsel %vm1084_vm15, %v1367_v54, 0 }
 0x28b   : > { %v1149_v51 = vsel %vm1084_vm15, %v3776_v61, 0 }
 0x28c   : > { %v1014_v12 = vpop.f32.mrf.mxu3  ;;  %1161 = vmatpush.bf16.xpose.msra.mxu1 %v1149_v51  ;;  %v1422_v51 = vunpack.c.l.b16 %v3788_v22 }
 0x28d   : > { %v1061_v23 = vpack.c.bf16 %v1014_v12, %v1014_v12 }
 0x28e   : > { %v1045_v52 = vpop.f32.mrf.mxu0  ;;  %v3862_v12 = vpack.c.b16 %v1422_v51, %v1422_v51 }
 0x28f   : > { %v1074_v53 = vpack.c.bf16 %v1045_v52, %v1045_v52  ;;  %v1170_v58 = vunpack.c.l.b16 %v1061_v23 }
 0x291   : > { %v1331_v32 = vunpack.c.l.b16 %v1074_v53 }
 0x293   : > { %2624 = vmatmul.msk.bf16.vlgmr.msra.gmra.mxu1 %vm1084_vm15, %v3788_v22  ;;  %v3795_v1 = vpack.c.b16 %v1331_v32, %v1330_v56 }
 0x294   : > { %1264 = vmatpush.bf16.msrb.mxu1 %v1256_v42  ;;  %v1016_v57 = vpop.f32.mrf.mxu3  ;;  %v1365_v42 = vpop.permute.xlu1 %1364 }
 0x295   : > { %v1062_v31 = vpack.c.bf16 %v1016_v57, %v1016_v57  ;;  %v1372_v7 = vsel %vm1084_vm15, %v1365_v42, 0 }
 0x297   : > { %v1171_v36 = vunpack.c.l.b16 %v1062_v31 }
 0x298   : > { %1265 = vmatpush.bf16.msrb.mxu1 %v3784_v27 }
 0x299   : > { %v3806_v4 = vpack.c.b16 %v1171_v36, %v1170_v58 }
 0x29b   : > { %v1179_v8 = vsel %vm1084_vm15, %v3806_v4, 0 }
 0x29c   : > { %1348 = vmatpush.bf16.msra.mxu1 %v1340_v46  ;;  %1191 = vmatpush.bf16.xpose.msrb.mxu2 %v1179_v8  ;;  %v1394_v53 = vpop.permute.xlu1 %1393 }
 0x2a0   : > { %1349 = vmatpush.bf16.msra.mxu1 %v3795_v1 }
 0x2a3   : > { %2625 = vmatmul.msk.bf16.vlgmr.msrb.gmra.mxu2 %vm1084_vm15, %v1051_v15 }
 0x2a4   : > { %1292 = vmatpush.bf16.msra.mxu2 %v1284_v59 }
 0x2a7   : > { %v3828_v24 = vpop.f32.mrf.mxu1 }
 0x2a8   : > { %1293 = vmatpush.bf16.msra.mxu2 %v3816_v14  ;;  %v1198_v48 = vsel %vm1197_vm7, %v3828_v24, -inf }
 0x2ac   : > { %1320 = vmatpush.bf16.msrb.mxu2 %v1312_v2 }
 0x2af   : > { %v1105_v10 = vpop.f32.mrf.mxu1 }
 0x2b0   : > { %1321 = vmatpush.bf16.msrb.mxu2 %v3826_v18 }
 0x2d5   : > { %v1396_v56 = vpop.permute.xlu2 %1395 }
 0x2d6   : > { %v1403_v13 = vsel %vm1084_vm15, %v1396_v56, 0 }
 0x2dd   : > { %v1363_v36 = vpop.permute.xlu2 %1362 }
 0x306   : > { %v1133_v28 = vpop.f32.mrf.mxu2 }
 0x307   : > { %v1201_v63 = vsel %vm1197_vm7, %v1133_v28, -inf }
 0x308   : > { %1202 = vmax.xlane.f32.xlu0 %v1201_v63 }
 0x30e   : > { %v1135_v45 = vpop.f32.mrf.mxu2 }
 0x310   : > { %v1163_v34 = vpop.f32.mrf.mxu1 }
 0x311   : > { %v1204_v21 = vsel %vm1197_vm7, %v1163_v34, -inf }
 0x312   : > { %1205 = vmax.xlane.f32.xlu1 %v1204_v21 }
 0x318   : > { %v1165_v37 = vpop.f32.mrf.mxu1 }
 0x31c   : > { %1397 = vrot.lane.b32.xlu0 %v3714_v30, %s3242_s27 }
 0x326   : > { %v3835_v29 = vpop.f32.mrf.mxu2 }
 0x327   : > { %v1207_v39 = vsel %vm1197_vm7, %v3835_v29, -inf }
 0x328   : > { %1208 = vmax.xlane.f32.xlu2 %v1207_v39 }
 0x32b   : > { %1428 = vrot.lane.b32.xlu1 %v3730_v25, %s3242_s27 }
 0x32e   : > { %v1195_v44 = vpop.f32.mrf.mxu2 }
 0x333   : > { %1459 = vrot.lane.b32.xlu1 %v3753_v11, %s3242_s27 }
 0x33b   : > { %1426 = vrot.lane.b32.xlu1 %v3776_v61, %s3242_s27 }
 0x340   : > { %1529 = vrot.lane.b32.xlu2 %v3774_v47, %s3242_s27 }
 0x343   : > { %1457 = vrot.lane.b32.xlu1 %v3806_v4, %s3242_s27 }
 0x346   : > { %1199 = vmax.xlane.f32.xlu0 %v1198_v48 }
 0x348   : > { %1631 = vrot.lane.b32.xlu2 %v3695_v5, %s3243_s9 }
 0x34b   : > { %1455 = vrot.lane.b32.xlu1 %v3853_v50, %s3242_s27 }
 0x350   : > { %1629 = vrot.lane.b32.xlu2 %v3732_v0, %s3243_s9 }
 0x353   : > { %1627 = vrot.lane.b32.xlu1 %v3765_v19, %s3243_s9 }
 0x358   : > { %1655 = vrot.lane.b32.xlu2 %v3740_v41, %s3243_s9 }
 0x35a   : > { %1424 = vrot.lane.b32.xlu0 %v3862_v12, %s3242_s27 }
 0x35b   : > { %1577 = vrot.lane.b32.xlu1 %v3814_v9, %s3242_s27 }
 0x362   : > { %1553 = vrot.lane.b32.xlu0 %v3801_v33, %s3242_s27 }
 0x363   : > { %1601 = vrot.lane.b32.xlu1 %v3782_v62, %s3242_s27 }
 0x36a   : > { %1527 = vrot.lane.b32.xlu0 %v3784_v27, %s3242_s27 }
 0x36b   : > { %1575 = vrot.lane.b32.xlu1 %v3826_v18, %s3242_s27 }
 0x372   : > { %1551 = vrot.lane.b32.xlu0 %v3816_v14, %s3242_s27 }
 0x37a   : > { %1659 = vrot.lane.b32.xlu0 %v3714_v30, %s3243_s9 }
 0x37b   : > { %v1203_v43 = vpop.xlane.xlu0 %1202 }
 0x37c   : > { %v1211_v52 = vsub.f32 %v1133_v28, %v1203_v43 }
 0x37e   : > { %v1216_v17 = vmul.f32 1.442695, %v1211_v52 }
 0x380   : > { %2903 = vpow2.f32 %v1216_v17 }
 0x382   : > { %1657 = vrot.lane.b32.xlu0 %v3755_v40, %s3243_s9 }
 0x385   : > { %v1206_v32 = vpop.xlane.xlu1 %1205 }
 0x386   : > { %v3884_v22 = vpop.eup %2903  ;;  %v1212_v46 = vsub.f32 %v1163_v34, %v1206_v32 }
 0x387   : > { %v1239_v23 = vpack.c.bf16 %v3884_v22, %v3884_v22 }
 0x388   : > { %v1218_v57 = vmul.f32 1.442695, %v1212_v46 }
 0x389   : > { %2627 = vmatmul.msk.bf16.vlgmr.msra.gmra.mxu2 %vm1197_vm7, %v1239_v23 }
 0x38a   : > { %1383 = vmatpush.bf16.xpose.msra.mxu2 %v1375_v55  ;;  %1599 = vrot.lane.b32.xlu0 %v3795_v1, %s3242_s27  ;;  %2905 = vpow2.f32 %v1218_v57 }
 0x38e   : > { %v1398_v31 = vpop.permute.xlu0 %1397 }
 0x38f   : > { %v1406_v35 = vsel %vm1084_vm15, %v1398_v31, 0 }
 0x390   : > { %1414 = vmatpush.bf16.xpose.msra.mxu3 %v1406_v35  ;;  %v3894_v58 = vpop.eup %2905 }
 0x391   : > { %v1240_v6 = vpack.c.bf16 %v3894_v58, %v3894_v58 }
 0x392   : > { %1384 = vmatpush.bf16.xpose.msra.mxu2 %v1372_v7 }
 0x398   : > { %1415 = vmatpush.bf16.xpose.msra.mxu3 %v1403_v13 }
 0x399   : > { %2628 = vmatmul.msk.bf16.vlgmr.msrb.gmra.mxu2 %vm1197_vm7, %v1240_v6 }
 0x39b   : > { %v1209_v26 = vpop.xlane.xlu2 %1208 }
 0x39c   : > { %v1213_v34 = vsub.f32 %v3835_v29, %v1209_v26 }
 0x39d   : > { %v1429_v8 = vpop.permute.xlu1 %1428 }
 0x39e   : > { %v1437_v59 = vsel %vm1084_vm15, %v1429_v8, 0  ;;  %v1220_v44 = vmul.f32 1.442695, %v1213_v34 }
 0x39f   : > { %2631 = vmatmul.msk.bf16.vlgmr.msra.gmra.mxu3 %vm1084_vm15, %v1394_v53  ;;  %1445 = vmatpush.bf16.xpose.msra.mxu0 %v1437_v59 }
 0x3a3   : > { %v1530_v38 = vpop.permute.xlu2 %1529 }
 0x3a4   : > { %v1536_v60 = vsel %vm1254_vm6, %v1530_v38, 0 }
 0x3a5   : > { %v1460_v3 = vpop.permute.xlu1 %1459  ;;  %1544 = vmatpush.bf16.msrb.mxu2 %v1536_v60 }
 0x3a6   : > { %v1468_v39 = vsel %vm1084_vm15, %v1460_v3, 0 }
 0x3a9   : > { %2630 = vmatmul.msk.bf16.vlgmr.msra.gmra.mxu2 %vm1084_vm15, %v1363_v36 }
 0x3ab   : > { %v1632_v54 = vpop.permute.xlu2 %1631 }
 0x3ac   : > { %v1640_v23 = vsel %vm1084_vm15, %v1632_v54, 0 }
 0x3ad   : > { %v1427_v15 = vpop.permute.xlu1 %1426 }
 0x3ae   : > { %v1434_v16 = vsel %vm1084_vm15, %v1427_v15, 0 }
 0x3af   : > { %1446 = vmatpush.bf16.xpose.msra.mxu0 %v1434_v16 }
 0x3b3   : > { %v1630_v55 = vpop.permute.xlu2 %1629 }
 0x3b4   : > { %v1637_v57 = vsel %vm1084_vm15, %v1630_v55, 0 }
 0x3b5   : > { %v1458_v2 = vpop.permute.xlu1 %1457 }
 0x3b6   : > { %v1465_v49 = vsel %vm1084_vm15, %v1458_v2, 0 }
 0x3b9   : > { %v1200_v20 = vpop.xlane.xlu0 %1199 }
 0x3ba   : > { %v1210_v10 = vsub.f32 %v3828_v24, %v1200_v20 }
 0x3bc   : > { %v1214_v28 = vmul.f32 1.442695, %v1210_v10 }
 0x3bd   : > { %v1456_v63 = vpop.permute.xlu1 %1455 }
 0x3be   : > { %2907 = vpow2.f32 %v1214_v28 }
 0x3bf   : > { %2909 = vpow2.f32 %v1220_v44 }
 0x3c4   : > { %v3906_v45 = vpop.eup %2907 }
 0x3c5   : > { %v1238_v21 = vpack.c.bf16 %v3906_v45, %v3906_v45  ;;  %v3911_v37 = vpop.permute.xlu1 %1627  ;;  %v3918_v51 = vpop.eup %2909 }
 0x3c6   : > { %v1241_v43 = vpack.c.bf16 %v3918_v51, %v3918_v51 }
 0x3c7   : > { %2626 = vmatmul.msk.bf16.vlgmr.msrb.gmra.mxu1 %vm1197_vm7, %v1238_v21 }
 0x3c8   : > { %1476 = vmatpush.bf16.xpose.msrb.mxu1 %v1468_v39 }
 0x3cc   : > { %v1425_v24 = vpop.permute.xlu0 %1424 }
 0x3cd   : > { %2632 = vmatmul.msk.bf16.vlgmr.msra.gmra.mxu0 %vm1084_vm15, %v1425_v24  ;;  %v1578_v48 = vpop.permute.xlu1 %1577 }
 0x3ce   : > { %v1584_v29 = vsel %vm1254_vm6, %v1578_v48, 0 }
 0x3cf   : > { %1592 = vmatpush.bf16.msrb.mxu0 %v1584_v29 }
 0x3d0   : > { %1477 = vmatpush.bf16.xpose.msrb.mxu1 %v1465_v49 }
 0x3d4   : > { %v1554_v42 = vpop.permute.xlu0 %1553 }
 0x3d5   : > { %v1560_v52 = vsel %vm1254_vm6, %v1554_v42, 0  ;;  %v1602_v53 = vpop.permute.xlu1 %1601 }
 0x3d6   : > { %1568 = vmatpush.bf16.msrb.mxu3 %v1560_v52  ;;  %v1608_v17 = vsel %vm1254_vm6, %v1602_v53, 0 }
 0x3d7   : > { %2629 = vmatmul.msk.bf16.vlgmr.msra.gmra.mxu1 %vm1197_vm7, %v1241_v43 }
 0x3d8   : > { %1616 = vmatpush.bf16.msra.mxu1 %v1608_v17 }
 0x3dc   : > { %v1528_v32 = vpop.permute.xlu0 %1527 }
 0x3dd   : > { %1545 = vmatpush.bf16.msrb.mxu2 %v1528_v32  ;;  %v1576_v46 = vpop.permute.xlu1 %1575 }
 0x3de   : > { %1593 = vmatpush.bf16.msrb.mxu0 %v1576_v46 }
 0x3e1   : > { %1648 = vmatpush.bf16.xpose.msra.mxu2 %v1640_v23 }
 0x3e4   : > { %v1552_v56 = vpop.permute.xlu0 %1551 }
 0x3e5   : > { %1569 = vmatpush.bf16.msrb.mxu3 %v1552_v56 }
 0x3e7   : > { %2633 = vmatmul.msk.bf16.vlgmr.msrb.gmra.mxu1 %vm1084_vm15, %v1456_v63 }
 0x3e9   : > { %1649 = vmatpush.bf16.xpose.msra.mxu2 %v1637_v57 }
 0x3ec   : > { %v1660_v31 = vpop.permute.xlu0 %1659 }
 0x3ed   : > { %v1668_v35 = vsel %vm1084_vm15, %v1660_v31, 0 }
 0x3ee   : > { %1676 = vmatpush.bf16.xpose.msra.mxu3 %v1668_v35 }
 0x3f4   : > { %v1658_v7 = vpop.permute.xlu0 %1657 }
 0x3f5   : > { %v1665_v36 = vsel %vm1084_vm15, %v1658_v7, 0 }
 0x3f6   : > { %1677 = vmatpush.bf16.xpose.msra.mxu3 %v1665_v36 }
 0x3fc   : > { %v1600_v13 = vpop.permute.xlu0 %1599 }
 0x3fd   : > { %1617 = vmatpush.bf16.msra.mxu1 %v1600_v13 }
 0x40c   : > { %v3930_v6 = vpop.f32.mrf.mxu2 }
 0x414   : > { %v1297_v26 = vpop.f32.mrf.mxu2 }
 0x41c   : > { %v3932_v8 = vpop.f32.mrf.mxu2 }
 0x422   : > { %v1417_v59 = vpop.f32.mrf.mxu3 }
 0x423   : > { %v1486_v38 = vsel %vm1197_vm7, %v1417_v59, -inf }
 0x424   : > { %1487 = vmax.xlane.f32.xlu2 %v1486_v38  ;;  %v1325_v60 = vpop.f32.mrf.mxu2 }
 0x42a   : > { %v1419_v3 = vpop.f32.mrf.mxu3 }
 0x42c   : > { %v1386_v15 = vpop.f32.mrf.mxu2 }
 0x42d   : > { %v1483_v16 = vsel %vm1197_vm7, %v1386_v15, -inf }
 0x42e   : > { %1484 = vmax.xlane.f32.xlu1 %v1483_v16 }
 0x434   : > { %v1388_v2 = vpop.f32.mrf.mxu2 }
 0x444   : > { %v3936_v20 = vpop.f32.mrf.mxu1 }
 0x447   : > { %1687 = vrot.lane.b32.xlu1 %v3730_v25, %s3243_s9 }
 0x44a   : > { %v1448_v10 = vpop.f32.mrf.mxu0 }
 0x44b   : > { %v1489_v28 = vsel %vm1197_vm7, %v1448_v10, -inf }
 0x44c   : > { %1490 = vmax.xlane.f32.xlu0 %v1489_v28  ;;  %v1269_v63 = vpop.f32.mrf.mxu1 }
 0x44f   : > { %1685 = vrot.lane.b32.xlu1 %v3776_v61, %s3243_s9 }
 0x452   : > { %v1450_v34 = vpop.f32.mrf.mxu0 }
 0x454   : > { %v3943_v21 = vpop.f32.mrf.mxu1 }
 0x457   : > { %1713 = vrot.lane.b32.xlu1 %v3806_v4, %s3243_s9 }
 0x45c   : > { %v1353_v39 = vpop.f32.mrf.mxu1 }
 0x45f   : > { %1711 = vrot.lane.b32.xlu1 %v3853_v50, %s3243_s9 }
 0x460   : > { %1683 = vrot.lane.b32.xlu0 %v3862_v12, %s3243_s9 }
 0x464   : > { %v1479_v44 = vpop.f32.mrf.mxu1 }
 0x465   : > { %v1492_v24 = vsel %vm1197_vm7, %v1479_v44, -inf }
 0x466   : > { %1493 = vmax.xlane.f32.xlu2 %v1492_v24 }
 0x467   : > { %1785 = vrot.lane.b32.xlu1 %v3774_v47, %s3243_s9 }
 0x468   : > { %1915 = vrot.lane.b32.xlu0 %v3714_v30, %s3244_s7  ;;  %v1656_v30 = vpop.permute.xlu2 %1655 }
 0x46c   : > { %v1481_v48 = vpop.f32.mrf.mxu1 }
 0x46f   : > { %1809 = vrot.lane.b32.xlu1 %v3801_v33, %s3243_s9 }
 0x477   : > { %1783 = vrot.lane.b32.xlu1 %v3784_v27, %s3243_s9 }
 0x47e   : > { %1715 = vrot.lane.b32.xlu2 %v3753_v11, %s3243_s9 }
 0x47f   : > { %1807 = vrot.lane.b32.xlu1 %v3816_v14, %s3243_s9 }
 0x486   : > { %1885 = vrot.lane.b32.xlu2 %v3732_v0, %s3244_s7 }
 0x487   : > { %1887 = vrot.lane.b32.xlu1 %v3695_v5, %s3244_s7 }
 0x48e   : > { %1883 = vrot.lane.b32.xlu2 %v3765_v19, %s3244_s7 }
 0x48f   : > { %1913 = vrot.lane.b32.xlu1 %v3755_v40, %s3244_s7 }
 0x496   : > { %1911 = vrot.lane.b32.xlu2 %v3740_v41, %s3244_s7 }
 0x497   : > { %v1488_v49 = vpop.xlane.xlu2 %1487  ;;  %1831 = vrot.lane.b32.xlu1 %v3826_v18, %s3243_s9 }
 0x498   : > { %v1496_v29 = vsub.f32 %v1417_v59, %v1488_v49 }
 0x49a   : > { %v1501_v42 = vmul.f32 1.442695, %v1496_v29 }
 0x49c   : > { %2911 = vpow2.f32 %v1501_v42 }
 0x49e   : > { %1833 = vrot.lane.b32.xlu2 %v3814_v9, %s3243_s9 }
 0x4a1   : > { %v1485_v5 = vpop.xlane.xlu1 %1484 }
 0x4a2   : > { %v3978_v0 = vpop.eup %2911  ;;  %v1495_v19 = vsub.f32 %v1386_v15, %v1485_v5 }
 0x4a3   : > { %v1524_v40 = vpack.c.bf16 %v3978_v0, %v3978_v0 }
 0x4a4   : > { %v1499_v43 = vmul.f32 1.442695, %v1495_v19 }
 0x4a5   : > { %2635 = vmatmul.msk.bf16.vlgmr.msrb.gmra.mxu3 %vm1197_vm7, %v1524_v40 }
 0x4a6   : > { %2913 = vpow2.f32 %v1499_v43  ;;  %1857 = vrot.lane.b32.xlu2 %v3782_v62, %s3243_s9 }
 0x4ac   : > { %v3985_v41 = vpop.eup %2913 }
 0x4ad   : > { %v1523_v52 = vpack.c.bf16 %v3985_v41, %v3985_v41 }
 0x4af   : > { %2634 = vmatmul.msk.bf16.vlgmr.msrb.gmra.mxu2 %vm1197_vm7, %v1523_v52 }
 0x4b5   : > { %2639 = vmatmul.msk.bf16.vlgmr.msra.gmra.mxu3 %vm1084_vm15, %v1656_v30 }
 0x4b9   : > { %v1688_v53 = vpop.permute.xlu1 %1687 }
 0x4ba   : > { %v1696_v17 = vsel %vm1084_vm15, %v1688_v53, 0 }
 0x4bb   : > { %1704 = vmatpush.bf16.xpose.msra.mxu0 %v1696_v17 }
 0x4bf   : > { %v1491_v54 = vpop.xlane.xlu0 %1490  ;;  %2638 = vmatmul.msk.bf16.vlgmr.msra.gmra.mxu2 %vm1084_vm15, %v3911_v37 }
 0x4c0   : > { %v1497_v32 = vsub.f32 %v1448_v10, %v1491_v54 }
 0x4c1   : > { %v1686_v23 = vpop.permute.xlu1 %1685 }
 0x4c2   : > { %v1503_v46 = vmul.f32 1.442695, %v1497_v32  ;;  %v1693_v55 = vsel %vm1084_vm15, %v1686_v23, 0 }
 0x4c3   : > { %1705 = vmatpush.bf16.xpose.msra.mxu0 %v1693_v55 }
 0x4c4   : > { %2915 = vpow2.f32 %v1503_v46 }
 0x4c9   : > { %v1714_v56 = vpop.permute.xlu1 %1713 }
 0x4ca   : > { %v3995_v57 = vpop.eup %2915  ;;  %v1721_v63 = vsel %vm1084_vm15, %v1714_v56, 0 }
 0x4cb   : > { %v1525_v31 = vpack.c.bf16 %v3995_v57, %v3995_v57 }
 0x4cd   : > { %2636 = vmatmul.msk.bf16.vlgmr.msrb.gmra.mxu0 %vm1197_vm7, %v1525_v31 }
 0x4d1   : > { %v1712_v35 = vpop.permute.xlu1 %1711 }
 0x4d2   : > { %v1684_v26 = vpop.permute.xlu0 %1683 }
 0x4d9   : > { %v1494_v7 = vpop.xlane.xlu2 %1493  ;;  %v1786_v36 = vpop.permute.xlu1 %1785 }
 0x4da   : > { %v1498_v13 = vsub.f32 %v1479_v44, %v1494_v7  ;;  %v1792_v37 = vsel %vm1254_vm6, %v1786_v36, 0  ;;  %v1916_v34 = vpop.permute.xlu0 %1915 }
 0x4db   : > { %1800 = vmatpush.bf16.msrb.mxu2 %v1792_v37  ;;  %v1924_v24 = vsel %vm1084_vm15, %v1916_v34, 0 }
 0x4dc   : > { %v1505_v59 = vmul.f32 1.442695, %v1498_v13 }
 0x4dd   : > { %2640 = vmatmul.msk.bf16.vlgmr.msra.gmra.mxu0 %vm1084_vm15, %v1684_v26 }
 0x4de   : > { %2917 = vpow2.f32 %v1505_v59 }
 0x4e1   : > { %v1716_v38 = vpop.permute.xlu2 %1715  ;;  %v1810_v60 = vpop.permute.xlu1 %1809 }
 0x4e2   : > { %v1724_v3 = vsel %vm1084_vm15, %v1716_v38, 0  ;;  %v1816_v15 = vsel %vm1254_vm6, %v1810_v60, 0 }
 0x4e3   : > { %1732 = vmatpush.bf16.xpose.msrb.mxu1 %v1724_v3  ;;  %1824 = vmatpush.bf16.msrb.mxu3 %v1816_v15 }
 0x4e4   : > { %v4004_v16 = vpop.eup %2917 }
 0x4e5   : > { %v1526_v2 = vpack.c.bf16 %v4004_v16, %v4004_v16 }
 0x4e7   : > { %2637 = vmatmul.msk.bf16.vlgmr.msra.gmra.mxu1 %vm1197_vm7, %v1526_v2 }
 0x4e9   : > { %v1886_v10 = vpop.permute.xlu2 %1885  ;;  %v1784_v28 = vpop.permute.xlu1 %1783 }
 0x4ea   : > { %1801 = vmatpush.bf16.msrb.mxu2 %v1784_v28  ;;  %v1893_v5 = vsel %vm1084_vm15, %v1886_v10, 0 }
 0x4eb   : > { %1733 = vmatpush.bf16.xpose.msrb.mxu1 %v1721_v63 }
 0x4f1   : > { %v4010_v39 = vpop.permute.xlu2 %1883  ;;  %v1808_v44 = vpop.permute.xlu1 %1807 }
 0x4f2   : > { %1825 = vmatpush.bf16.msrb.mxu3 %v1808_v44 }
 0x4f6   : > { %1932 = vmatpush.bf16.xpose.msra.mxu3 %v1924_v24 }
 0x4f7   : > { %2641 = vmatmul.msk.bf16.vlgmr.msrb.gmra.mxu1 %vm1084_vm15, %v1712_v35 }
 0x4f9   : > { %v4014_v48 = vpop.permute.xlu2 %1911  ;;  %v1888_v30 = vpop.permute.xlu1 %1887 }
 0x4fa   : > { %v1896_v49 = vsel %vm1084_vm15, %v1888_v30, 0 }
 0x4fb   : > { %1904 = vmatpush.bf16.xpose.msra.mxu2 %v1896_v49 }
 0x501   : > { %v1834_v29 = vpop.permute.xlu2 %1833  ;;  %v1914_v42 = vpop.permute.xlu1 %1913 }
 0x502   : > { %v1840_v19 = vsel %vm1254_vm6, %v1834_v29, 0  ;;  %v1921_v40 = vsel %vm1084_vm15, %v1914_v42, 0 }
 0x503   : > { %1848 = vmatpush.bf16.msrb.mxu0 %v1840_v19  ;;  %1905 = vmatpush.bf16.xpose.msra.mxu2 %v1893_v5 }
 0x504   : > { %1933 = vmatpush.bf16.xpose.msra.mxu3 %v1921_v40 }
 0x509   : > { %v1858_v43 = vpop.permute.xlu2 %1857  ;;  %v1832_v52 = vpop.permute.xlu1 %1831 }
 0x50a   : > { %v1864_v53 = vsel %vm1254_vm6, %v1858_v43, 0  ;;  %1849 = vmatpush.bf16.msrb.mxu0 %v1832_v52 }
 0x50b   : > { %1872 = vmatpush.bf16.msra.mxu1 %v1864_v53 }
 0x528   : > { %v4021_v17 = vpop.f32.mrf.mxu3 }
 0x530   : > { %v1573_v54 = vpop.f32.mrf.mxu3 }
 0x532   : > { %v4023_v32 = vpop.f32.mrf.mxu2 }
 0x538   : > { %v1679_v23 = vpop.f32.mrf.mxu3 }
 0x539   : > { %v1742_v46 = vsel %vm1197_vm7, %v1679_v23, -inf }
 0x53a   : > { %1743 = vmax.xlane.f32.xlu2 %v1742_v46  ;;  %v1549_v55 = vpop.f32.mrf.mxu2 }
 0x540   : > { %v1681_v56 = vpop.f32.mrf.mxu3 }
 0x542   : > { %v1651_v31 = vpop.f32.mrf.mxu2 }
 0x543   : > { %v1739_v35 = vsel %vm1197_vm7, %v1651_v31, -inf }
 0x544   : > { %1740 = vmax.xlane.f32.xlu0 %v1739_v35 }
 0x54a   : > { %v4027_v7 = vpop.f32.mrf.mxu0  ;;  %v1653_v36 = vpop.f32.mrf.mxu2 }
 0x552   : > { %v1597_v13 = vpop.f32.mrf.mxu0  ;;  %1855 = vrot.lane.b32.xlu2 %v3795_v1, %s3243_s9 }
 0x558   : > { %1943 = vrot.lane.b32.xlu0 %v3730_v25, %s3244_s7 }
 0x55a   : > { %1971 = vrot.lane.b32.xlu2 %v3753_v11, %s3244_s7  ;;  %v1707_v37 = vpop.f32.mrf.mxu0 }
 0x55b   : > { %v1745_v26 = vsel %vm1197_vm7, %v1707_v37, -inf }
 0x55c   : > { %1746 = vmax.xlane.f32.xlu1 %v1745_v26 }
 0x562   : > { %1941 = vrot.lane.b32.xlu2 %v3776_v61, %s3244_s7  ;;  %v1709_v59 = vpop.f32.mrf.mxu0 }
 0x564   : > { %v4038_v38 = vpop.f32.mrf.mxu1 }
 0x56a   : > { %1939 = vrot.lane.b32.xlu2 %v3862_v12, %s3244_s7 }
 0x56c   : > { %v1621_v60 = vpop.f32.mrf.mxu1 }
 0x572   : > { %2089 = vrot.lane.b32.xlu2 %v3814_v9, %s3244_s7 }
 0x574   : > { %v1735_v25 = vpop.f32.mrf.mxu1 }
 0x575   : > { %1969 = vrot.lane.b32.xlu1 %v3806_v4, %s3244_s7  ;;  %v1748_v61 = vsel %vm1197_vm7, %v1735_v25, -inf }
 0x57c   : > { %v1737_v11 = vpop.f32.mrf.mxu1 }
 0x57d   : > { %2113 = vrot.lane.b32.xlu1 %v3782_v62, %s3244_s7 }
 0x582   : > { %1749 = vmax.xlane.f32.xlu0 %v1748_v61 }
 0x596   : > { %1967 = vrot.lane.b32.xlu0 %v3853_v50, %s3244_s7 }
 0x59e   : > { %2041 = vrot.lane.b32.xlu0 %v3774_v47, %s3244_s7 }
 0x5a6   : > { %2065 = vrot.lane.b32.xlu0 %v3801_v33, %s3244_s7 }
 0x5ad   : > { %v1744_v9 = vpop.xlane.xlu2 %1743 }
 0x5ae   : > { %v1752_v12 = vsub.f32 %v1679_v23, %v1744_v9  ;;  %2039 = vrot.lane.b32.xlu0 %v3784_v27, %s3244_s7 }
 0x5b0   : > { %v1757_v4 = vmul.f32 1.442695, %v1752_v12 }
 0x5b2   : > { %2919 = vpow2.f32 %v1757_v4 }
 0x5b5   : > { %v1856_v62 = vpop.permute.xlu2 %1855 }
 0x5b6   : > { %1873 = vmatpush.bf16.msra.mxu1 %v1856_v62  ;;  %2063 = vrot.lane.b32.xlu0 %v3816_v14, %s3244_s7 }
 0x5b7   : > { %v1741_v3 = vpop.xlane.xlu0 %1740 }
 0x5b8   : > { %v4059_v50 = vpop.eup %2919  ;;  %v1751_v15 = vsub.f32 %v1651_v31, %v1741_v3 }
 0x5b9   : > { %v1780_v47 = vpack.c.bf16 %v4059_v50, %v4059_v50 }
 0x5ba   : > { %v1755_v33 = vmul.f32 1.442695, %v1751_v15 }
 0x5bb   : > { %2643 = vmatmul.msk.bf16.vlgmr.msrb.gmra.mxu3 %vm1197_vm7, %v1780_v47 }
 0x5bc   : > { %2921 = vpow2.f32 %v1755_v33 }
 0x5bd   : > { %v1972_v2 = vpop.permute.xlu2 %1971 }
 0x5be   : > { %v1980_v27 = vsel %vm1084_vm15, %v1972_v2, 0 }
 0x5bf   : > { %1988 = vmatpush.bf16.xpose.msrb.mxu1 %v1980_v27  ;;  %v1510_v27 = vsel %vm1197_vm7, %v3978_v0, 0.0  ;;  %v1516_v0 = vsel %vm1197_vm7, %v4004_v16, 0.0  ;;  %v1513_v16 = vsel %vm1197_vm7, %v3995_v57, 0.0 }
 0x5c2   : > { %v4065_v10 = vpop.eup %2921 }
 0x5c3   : > { %v1779_v14 = vpack.c.bf16 %v4065_v10, %v4065_v10 }
 0x5c5   : > { %2642 = vmatmul.msk.bf16.vlgmr.msrb.gmra.mxu2 %vm1197_vm7, %v1779_v14  ;;  %v1942_v28 = vpop.permute.xlu2 %1941  ;;  %v1766_v14 = vsel %vm1197_vm7, %v4059_v50, 0.0 }
 0x5c6   : > { %v1949_v29 = vsel %vm1084_vm15, %v1942_v28, 0 }
 0x5ca   : > { %v1944_v63 = vpop.permute.xlu0 %1943 }
 0x5cb   : > { %v1952_v34 = vsel %vm1084_vm15, %v1944_v63, 0  ;;  %2647 = vmatmul.msk.bf16.vlgmr.msra.gmra.mxu3 %vm1084_vm15, %v4014_v48 }
 0x5cc   : > { %1960 = vmatpush.bf16.xpose.msra.mxu0 %v1952_v34 }
 0x5cd   : > { %v1940_v24 = vpop.permute.xlu2 %1939 }
 0x5cf   : > { %v1747_v44 = vpop.xlane.xlu1 %1746 }
 0x5d0   : > { %v1753_v30 = vsub.f32 %v1707_v37, %v1747_v44 }
 0x5d2   : > { %v1759_v49 = vmul.f32 1.442695, %v1753_v30 }
 0x5d4   : > { %2923 = vpow2.f32 %v1759_v49  ;;  %1961 = vmatpush.bf16.xpose.msra.mxu0 %v1949_v29 }
 0x5d5   : > { %2646 = vmatmul.msk.bf16.vlgmr.msra.gmra.mxu2 %vm1084_vm15, %v4010_v39  ;;  %v2090_v5 = vpop.permute.xlu2 %2089 }
 0x5d6   : > { %v2096_v48 = vsel %vm1254_vm6, %v2090_v5, 0 }
 0x5da   : > { %v4076_v42 = vpop.eup %2923 }
 0x5db   : > { %v1781_v19 = vpack.c.bf16 %v4076_v42, %v4076_v42 }
 0x5dd   : > { %2644 = vmatmul.msk.bf16.vlgmr.msrb.gmra.mxu0 %vm1197_vm7, %v1781_v19 }
 0x5de   : > { %2104 = vmatpush.bf16.msrb.mxu0 %v2096_v48 }
 0x5e7   : > { %v1970_v40 = vpop.permute.xlu1 %1969 }
 0x5e8   : > { %v1977_v43 = vsel %vm1084_vm15, %v1970_v40, 0 }
 0x5e9   : > { %1989 = vmatpush.bf16.xpose.msrb.mxu1 %v1977_v43  ;;  %v1769_v43 = vsel %vm1197_vm7, %v4076_v42, 0.0  ;;  %v1225_v42 = vsel %vm1197_vm7, %v3884_v22, 0.0 }
 0x5ed   : > { %2648 = vmatmul.msk.bf16.vlgmr.msra.gmra.mxu0 %vm1084_vm15, %v1940_v24 }
 0x5ef   : > { %v2114_v23 = vpop.permute.xlu1 %2113 }
 0x5f0   : > { %v2120_v55 = vsel %vm1254_vm6, %v2114_v23, 0 }
 0x5f5   : > { %v1750_v52 = vpop.xlane.xlu0 %1749 }
 0x5f6   : > { %v1754_v53 = vsub.f32 %v1735_v25, %v1750_v52 }
 0x5f8   : > { %v1761_v39 = vmul.f32 1.442695, %v1754_v53 }
 0x5fa   : > { %2925 = vpow2.f32 %v1761_v39 }
 0x600   : > { %v4084_v54 = vpop.eup %2925 }
 0x601   : > { %v1782_v46 = vpack.c.bf16 %v4084_v54, %v4084_v54  ;;  %v1772_v39 = vsel %vm1197_vm7, %v4084_v54, 0.0 }
 0x603   : > { %2645 = vmatmul.msk.bf16.vlgmr.msra.gmra.mxu1 %vm1197_vm7, %v1782_v46 }
 0x604   : > { %2128 = vmatpush.bf16.msra.mxu1 %v2120_v55 }
 0x608   : > { %v1968_v56 = vpop.permute.xlu0 %1967 }
 0x610   : > { %v2042_v31 = vpop.permute.xlu0 %2041 }
 0x611   : > { %v2048_v35 = vsel %vm1254_vm6, %v2042_v31, 0 }
 0x612   : > { %2056 = vmatpush.bf16.msrb.mxu2 %v2048_v35 }
 0x613   : > { %2649 = vmatmul.msk.bf16.vlgmr.msrb.gmra.mxu1 %vm1084_vm15, %v1968_v56 }
 0x618   : > { %v2066_v36 = vpop.permute.xlu0 %2065 }
 0x619   : > { %v2072_v13 = vsel %vm1254_vm6, %v2066_v36, 0 }
 0x61a   : > { %2080 = vmatpush.bf16.msrb.mxu3 %v2072_v13 }
 0x620   : > { %v2040_v37 = vpop.permute.xlu0 %2039 }
 0x621   : > { %2057 = vmatpush.bf16.msrb.mxu2 %v2040_v37 }
 0x628   : > { %v2064_v26 = vpop.permute.xlu0 %2063 }
 0x629   : > { %2081 = vmatpush.bf16.msrb.mxu3 %v2064_v26 }
 0x63e   : > { %v4093_v59 = vpop.f32.mrf.mxu3 }
 0x646   : > { %v1829_v60 = vpop.f32.mrf.mxu3 }
 0x648   : > { %v4095_v25 = vpop.f32.mrf.mxu2 }
 0x64e   : > { %v1935_v11 = vpop.f32.mrf.mxu3 }
 0x64f   : > { %v1998_v61 = vsel %vm1197_vm7, %v1935_v11, -inf }
 0x650   : > { %1999 = vmax.xlane.f32.xlu2 %v1998_v61  ;;  %v1805_v9 = vpop.f32.mrf.mxu2 }
 0x656   : > { %v1937_v12 = vpop.f32.mrf.mxu3 }
 0x658   : > { %v4098_v4 = vpop.f32.mrf.mxu2 }
 0x659   : > { %v1995_v50 = vsel %vm1197_vm7, %v4098_v4, -inf }
 0x65a   : > { %v4100_v62 = vpop.f32.mrf.mxu0 }
 0x660   : > { %v1909_v3 = vpop.f32.mrf.mxu2 }
 0x662   : > { %v1853_v15 = vpop.f32.mrf.mxu0 }
 0x668   : > { %2087 = vrot.lane.b32.xlu2 %v3826_v18, %s3244_s7  ;;  %v1507_v18 = vsel %vm1197_vm7, %v3985_v41, 0.0 }
 0x66a   : > { %v1963_v47 = vpop.f32.mrf.mxu0 }
 0x66b   : > { %v2001_v33 = vsel %vm1197_vm7, %v1963_v47, -inf }
 0x66c   : > { %2002 = vmax.xlane.f32.xlu0 %v2001_v33 }
 0x672   : > { %v1965_v2 = vpop.f32.mrf.mxu0 }
 0x674   : > { %1511 = vadd.xlane.f32.xlu0 %v1510_v27 }
 0x67c   : > { %1767 = vadd.xlane.f32.xlu0 %v1766_v14 }
 0x680   : > { %v4109_v28 = vpop.f32.mrf.mxu1 }
 0x688   : > { %v1877_v63 = vpop.f32.mrf.mxu1 }
 0x690   : > { %v1991_v34 = vpop.f32.mrf.mxu1 }
 0x691   : > { %1508 = vadd.xlane.f32.xlu2 %v1507_v18  ;;  %v2004_v44 = vsel %vm1197_vm7, %v1991_v34, -inf }
 0x692   : > { %2005 = vmax.xlane.f32.xlu1 %v2004_v44 }
 0x698   : > { %v1993_v24 = vpop.f32.mrf.mxu1 }
 0x699   : > { %1517 = vadd.xlane.f32.xlu2 %v1516_v0 }
 0x69a   : > { %1996 = vmax.xlane.f32.xlu1 %v1995_v50 }
 0x6b3   : > { %2111 = vrot.lane.b32.xlu1 %v3795_v1, %s3244_s7  ;;  %v1763_v1 = vsel %vm1197_vm7, %v4065_v10, 0.0  ;;  %v1222_v10 = vsel %vm1197_vm7, %v3906_v45, 0.0 }
 0x6c3   : > { %v2000_v30 = vpop.xlane.xlu2 %1999 }
 0x6c4   : > { %v2008_v49 = vsub.f32 %v1935_v11, %v2000_v30 }
 0x6c6   : > { %v2013_v29 = vmul.f32 1.442695, %v2008_v49 }
 0x6c8   : > { %2927 = vpow2.f32 %v2013_v29  ;;  %v1228_v29 = vsel %vm1197_vm7, %v3894_v58, 0.0 }
 0x6cb   : > { %v2088_v41 = vpop.permute.xlu2 %2087 }
 0x6cc   : > { %2105 = vmatpush.bf16.msrb.mxu0 %v2088_v41 }
 0x6ce   : > { %v2928_v5 = vpop.eup %2927 }
 0x6cf   : > { %v2036_v19 = vpack.c.bf16 %v2928_v5, %v2928_v5  ;;  %v2022_v48 = vsel %vm1197_vm7, %v2928_v5, 0.0 }
 0x6d0   : > { %2023 = vadd.xlane.f32.xlu0 %v2022_v48 }
 0x6d1   : > { %2651 = vmatmul.msk.bf16.vlgmr.msrb.gmra.mxu3 %vm1197_vm7, %v2036_v19 }
 0x6d8   : > { %1514 = vadd.xlane.f32.xlu0 %v1513_v16 }
 0x6dd   : > { %1764 = vadd.xlane.f32.xlu1 %v1763_v1  ;;  %v1231_v1 = vsel %vm1197_vm7, %v3918_v51, 0.0 }
 0x6df   : > { %v2003_v40 = vpop.xlane.xlu0 %2002 }
 0x6e0   : > { %v2009_v52 = vsub.f32 %v1963_v47, %v2003_v40  ;;  %1770 = vadd.xlane.f32.xlu0 %v1769_v43 }
 0x6e2   : > { %v2015_v53 = vmul.f32 1.442695, %v2009_v52 }
 0x6e4   : > { %2929 = vpow2.f32 %v2015_v53 }
 0x6e5   : > { %1773 = vadd.xlane.f32.xlu1 %v1772_v39 }
 0x6e7   : > { %v1512_v11 = vpop.xlane.xlu0 %1511 }
 0x6ea   : > { %v2930_v23 = vpop.eup %2929 }
 0x6eb   : > { %v2037_v46 = vpack.c.bf16 %v2930_v23, %v2930_v23  ;;  %v2025_v57 = vsel %vm1197_vm7, %v2930_v23, 0.0 }
 0x6ec   : > { %2026 = vadd.xlane.f32.xlu2 %v2025_v57 }
 0x6ed   : > { %2652 = vmatmul.msk.bf16.vlgmr.msrb.gmra.mxu0 %vm1197_vm7, %v2037_v46  ;;  %1223 = vadd.xlane.f32.xlu1 %v1222_v10 }
 0x6ef   : > { %v1768_v33 = vpop.xlane.xlu0 %1767 }
 0x6f4   : > { %1226 = vadd.xlane.f32.xlu2 %v1225_v42 }
 0x704   : > { %v1509_v22 = vpop.xlane.xlu2 %1508 }
 0x705   : > { %v2006_v55 = vpop.xlane.xlu1 %2005 }
 0x706   : > { %v2010_v56 = vsub.f32 %v1991_v34, %v2006_v55 }
 0x708   : > { %v2017_v31 = vmul.f32 1.442695, %v2010_v56 }
 0x70a   : > { %2931 = vpow2.f32 %v2017_v31 }
 0x70c   : > { %v1518_v27 = vpop.xlane.xlu2 %1517 }
 0x70d   : > { %v1997_v54 = vpop.xlane.xlu1 %1996 }
 0x70e   : > { %v2007_v35 = vsub.f32 %v4098_v4, %v1997_v54 }
 0x710   : > { %v2932_v36 = vpop.eup %2931  ;;  %v2011_v13 = vmul.f32 1.442695, %v2007_v35 }
 0x711   : > { %v2028_v37 = vsel %vm1197_vm7, %v2932_v36, 0.0  ;;  %v2038_v4 = vpack.c.bf16 %v2932_v36, %v2932_v36 }
 0x712   : > { %2933 = vpow2.f32 %v2011_v13  ;;  %2029 = vadd.xlane.f32.xlu0 %v2028_v37  ;;  %v2741_v37 = vld [vmem:[#allocation11 + $0x38] sm:$0xff] }
 0x713   : > { %2935 = vrcp.f32 %v1509_v22  ;;  %2267 = vmatpush.bf16.msra.mxu2 %v2741_v37  ;;  %v2735_v22 = vld [vmem:[#allocation11 + $0x8] sm:$0xff] }
 0x714   : > { %2937 = vrcp.f32 %v1512_v11  ;;  %v2734_v11 = vld [vmem:[#allocation11] sm:$0xff] }
 0x715   : > { %2939 = vrcp.f32 %v1518_v27 }
 0x718   : > { %v2934_v45 = vpop.eup %2933 }
 0x719   : > { %v2035_v26 = vpack.c.bf16 %v2934_v45, %v2934_v45  ;;  %v2019_v60 = vsel %vm1197_vm7, %v2934_v45, 0.0  ;;  %v2936_v61 = vpop.eup %2935  ;;  %v2739_v45 = vld [vmem:[#allocation11 + $0x28] sm:$0xff] }
 0x71a   : > { %2020 = vadd.xlane.f32.xlu0 %v2019_v60  ;;  %v2938_v12 = vpop.eup %2937  ;;  %v1623_v3 = vmul.f32 %v2936_v61, %v4023_v32  ;;  %v2736_v60 = vld [vmem:[#allocation11 + $0x10] sm:$0xff] }
 0x71b   : > { %2650 = vmatmul.msk.bf16.vlgmr.msrb.gmra.mxu2 %vm1197_vm7, %v2035_v26  ;;  %v1624_v15 = vmul.f32 %v2938_v12, %v4021_v17  ;;  %v2940_v63 = vpop.eup %2939  ;;  %v2738_v26 = vld [vmem:[#allocation11 + $0x20] sm:$0xff] }
 0x71c   : > { %v1626_v44 = vmul.f32 %v2940_v63, %v4038_v38 }
 0x71d   : > { %v2847_v47 = vpack.i.bf16 %v1624_v15, %v1623_v3 }
 0x725   : > { %v2112_v9 = vpop.permute.xlu1 %2111 }
 0x726   : > { %2129 = vmatpush.bf16.msra.mxu1 %v2112_v9 }
 0x729   : > { %2653 = vmatmul.msk.bf16.vlgmr.msra.gmra.mxu1 %vm1197_vm7, %v2038_v4 }
 0x72e   : > { %2848 = vrot.lane.b32.xlu0 %v2847_v47, %s3244_s7 }
 0x743   : > { %v2024_v2 = vpop.xlane.xlu0 %2023 }
 0x74b   : > { %v1515_v14 = vpop.xlane.xlu0 %1514 }
 0x74c   : > { %2941 = vrcp.f32 %v1515_v14 }
 0x74d   : > { %2943 = vrcp.f32 %v2024_v2 }
 0x74e   : > { %2945 = vrcp.f32 %v1768_v33 }
 0x750   : > { %v1765_v34 = vpop.xlane.xlu1 %1764 }
 0x751   : > { %2947 = vrcp.f32 %v1765_v34 }
 0x752   : > { %v2942_v18 = vpop.eup %2941 }
 0x753   : > { %v1625_v32 = vmul.f32 %v2942_v18, %v4027_v7  ;;  %v2944_v17 = vpop.eup %2943  ;;  %v1771_v16 = vpop.xlane.xlu0 %1770 }
 0x754   : > { %v2083_v24 = vpop.f32.mrf.mxu3  ;;  %v2946_v0 = vpop.eup %2945 }
 0x755   : > { %v2136_v50 = vmul.f32 %v2944_v17, %v2083_v24  ;;  %v2857_v30 = vpack.i.bf16 %v1626_v44, %v1625_v32  ;;  %v1880_v5 = vmul.f32 %v2946_v0, %v4093_v59 }
 0x757   : > { %v2948_v49 = vpop.eup %2947  ;;  %2858 = vrot.lane.b32.xlu2 %v2857_v30, %s3244_s7 }
 0x758   : > { %1229 = vadd.xlane.f32.xlu0 %v1228_v29  ;;  %v1879_v41 = vmul.f32 %v2948_v49, %v4095_v25  ;;  %v1774_v58 = vpop.xlane.xlu1 %1773 }
 0x75a   : > { %v2852_v19 = vpack.i.bf16 %v1880_v5, %v1879_v41 }
 0x75c   : > { %v2085_v7 = vpop.f32.mrf.mxu3  ;;  %2853 = vrot.lane.b32.xlu1 %v2852_v19, %s3243_s9 }
 0x75f   : > { %v2027_v46 = vpop.xlane.xlu2 %2026 }
 0x760   : > { %v1224_v9 = vpop.xlane.xlu1 %1223 }
 0x767   : > { %v1227_v61 = vpop.xlane.xlu2 %1226 }
 0x76a   : > { %v2107_v38 = vpop.f32.mrf.mxu0 }
 0x772   : > { %v2109_v48 = vpop.f32.mrf.mxu0 }
 0x785   : > { %v2030_v40 = vpop.xlane.xlu0 %2029 }
 0x786   : > { %1232 = vadd.xlane.f32.xlu1 %v1231_v1 }
 0x78d   : > { %v2021_v43 = vpop.xlane.xlu0 %2020 }
 0x78e   : > { %2949 = vrcp.f32 %v2021_v43 }
 0x78f   : > { %2951 = vrcp.f32 %v1774_v58 }
 0x790   : > { %2953 = vrcp.f32 %v1771_v16 }
 0x791   : > { %2955 = vrcp.f32 %v2030_v40 }
 0x792   : > { %2957 = vrcp.f32 %v2027_v46 }
 0x793   : > { %2959 = vrcp.f32 %v1224_v9 }
 0x794   : > { %v2950_v52 = vpop.eup %2949  ;;  %2961 = vrcp.f32 %v1227_v61 }
 0x795   : > { %v2952_v39 = vpop.eup %2951 }
 0x796   : > { %v2954_v23 = vpop.eup %2953  ;;  %v1882_v57 = vmul.f32 %v2952_v39, %v4109_v28  ;;  %v2740_v28 = vld [vmem:[#allocation11 + $0x30] sm:$0xff] }
 0x797   : > { %v1881_v42 = vmul.f32 %v2954_v23, %v4100_v62  ;;  %v2956_v56 = vpop.eup %2955  ;;  %2268 = vmatpush.bf16.msra.mxu2 %v2740_v28  ;;  %v2737_v62 = vld [vmem:[#allocation11 + $0x18] sm:$0xff] }
 0x798   : > { %v2958_v54 = vpop.eup %2957 }
 0x799   : > { %v2867_v55 = vpack.i.bf16 %v1882_v57, %v1881_v42  ;;  %v2137_v36 = vmul.f32 %v2958_v54, %v2107_v38  ;;  %v2960_v15 = vpop.eup %2959 }
 0x79a   : > { %v2962_v47 = vpop.eup %2961  ;;  %v1355_v63 = vmul.f32 %v2960_v15, %v3936_v20 }
 0x79b   : > { %2269 = vmatpush.bf16.msra.mxu2 %v2739_v45  ;;  %v1356_v34 = vmul.f32 %v2962_v47, %v3930_v6 }
 0x79e   : > { %v2059_v25 = vpop.f32.mrf.mxu2 }
 0x79f   : > { %v2135_v59 = vmul.f32 %v2950_v52, %v2059_v25  ;;  %2270 = vmatpush.bf16.msra.mxu2 %v2738_v26 }
 0x7a0   : > { %v2849_v12 = vpop.permute.xlu0 %2848 }
 0x7a1   : > { %v2862_v53 = vpack.i.bf16 %v2136_v50, %v2135_v59  ;;  %v2851_v33 = vunpack.i.h.bf16 %v2849_v12  ;;  %v2850_v2 = vunpack.i.l.bf16 %v2849_v12 }
 0x7a3   : > { %2863 = vrot.lane.b32.xlu2 %v2862_v53, %s3242_s27  ;;  %2271 = vmatpush.bf16.msra.mxu2 %v2737_v62  ;;  %v2188_v44 = vsel %vm1084_vm15, %v1356_v34, %v2851_v33  ;;  %v2187_v17 = vsel %vm1084_vm15, %v1355_v63, %v2850_v2 }
 0x7a6   : > { %v2061_v51 = vpop.f32.mrf.mxu2  ;;  %v2131_v10 = vpop.f32.mrf.mxu1 }
 0x7a7   : > { %v2138_v31 = vmul.f32 %v2956_v56, %v2131_v10  ;;  %2272 = vmatpush.bf16.msra.mxu2 %v2736_v60 }
 0x7a9   : > { %v2872_v13 = vpack.i.bf16 %v2138_v31, %v2137_v36 }
 0x7ab   : > { %2868 = vrot.lane.b32.xlu2 %v2867_v55, %s3243_s9  ;;  %2273 = vmatpush.bf16.msra.mxu2 %v2735_v22 }
 0x7ae   : > { %v2133_v35 = vpop.f32.mrf.mxu1 }
 0x7af   : > { %2274 = vmatpush.bf16.msra.mxu2 %v2734_v11 }
 0x7b1   : > { %v2859_v4 = vpop.permute.xlu2 %2858 }
 0x7b2   : > { %v2861_v1 = vunpack.i.h.bf16 %v2859_v4  ;;  %v2860_v40 = vunpack.i.l.bf16 %v2859_v4 }
 0x7b3   : > { %2873 = vrot.lane.b32.xlu2 %v2872_v13, %s3242_s27 }
 0x7cb   : > { %v1230_v18 = vpop.xlane.xlu0 %1229 }
 0x7cc   : > { %2963 = vrcp.f32 %v1230_v18 }
 0x7ce   : > { %v2854_v3 = vpop.permute.xlu1 %2853 }
 0x7cf   : > { %v2856_v27 = vunpack.i.h.bf16 %v2854_v3  ;;  %v2855_v14 = vunpack.i.l.bf16 %v2854_v3 }
 0x7d1   : > { %v2193_v30 = vsel %vm2191_vm8, %v2188_v44, %v2856_v27  ;;  %v2192_v49 = vsel %vm2191_vm8, %v2187_v17, %v2855_v14 }
 0x7d2   : > { %v2964_v5 = vpop.eup %2963 }
 0x7d3   : > { %v1357_v7 = vmul.f32 %v2964_v5, %v3932_v8 }
 0x7d5   : > { %v2189_v25 = vsel %vm1084_vm15, %v1357_v7, %v2860_v40 }
 0x7f9   : > { %v1233_v24 = vpop.xlane.xlu1 %1232 }
 0x7fa   : > { %2965 = vrcp.f32 %v1233_v24 }
 0x7fd   : > { %v2864_v32 = vpop.permute.xlu2 %2863 }
 0x7fe   : > { %v2866_v0 = vunpack.i.h.bf16 %v2864_v32  ;;  %v2865_v50 = vunpack.i.l.bf16 %v2864_v32 }
 0x800   : > { %v2198_v20 = vsel %vm2196_vm9, %v2193_v30, %v2866_v0  ;;  %v2197_v6 = vsel %vm2196_vm9, %v2192_v49, %v2865_v50  ;;  %v2966_v19 = vpop.eup %2965 }
 0x801   : > { %v2201_v29 = vpack.c.bf16 %v2198_v20, %v2197_v6  ;;  %v1358_v38 = vmul.f32 %v2966_v19, %v3943_v21 }
 0x803   : > { %2275 = vmatmul.bf16.vlgmr.msra.gmra.mxu2 %v2201_v29  ;;  %v2190_v59 = vsel %vm1084_vm15, %v1358_v38, %v2861_v1 }
 0x805   : > { %v2869_v41 = vpop.permute.xlu2 %2868 }
 0x806   : > { %v2871_v48 = vunpack.i.h.bf16 %v2869_v41  ;;  %v2870_v16 = vunpack.i.l.bf16 %v2869_v41 }
 0x808   : > { %v2194_v53 = vsel %vm2191_vm8, %v2189_v25, %v2870_v16  ;;  %v2195_v39 = vsel %vm2191_vm8, %v2190_v59, %v2871_v48 }
 0x80d   : > { %v2874_v43 = vpop.permute.xlu2 %2873 }
 0x80e   : > { %v2876_v58 = vunpack.i.h.bf16 %v2874_v43  ;;  %v2875_v52 = vunpack.i.l.bf16 %v2874_v43 }
 0x810   : > { %v2199_v8 = vsel %vm2196_vm9, %v2194_v53, %v2875_v52  ;;  %v2200_v21 = vsel %vm2196_vm9, %v2195_v39, %v2876_v58 }
 0x811   : > { %v2202_v23 = vpack.c.bf16 %v2200_v21, %v2199_v8 }
 0x813   : > { %2280 = vmatmul.bf16.gmra.mxu2 %v2202_v23 }
 0x886   : > { %v2276_v46 = vpop.f32.mrf.mxu2 }
 0x887   : > { %2286 = vst [vmem:[%s378_s2] sm:$0xff] %v2276_v46 }
 0x88e   : > { %v2278_v57 = vpop.f32.mrf.mxu2 }
 0x88f   : > { %2287 = vst [vmem:[%s378_s2 + $0x8] sm:$0xff] %v2278_v57 }
 0x896   : > { %v2281_v51 = vpop.f32.mrf.mxu2 }
 0x897   : > { %2288 = vst [vmem:[%s378_s2 + $0x10] sm:$0xff] %v2281_v51 }
 0x89e   : > { %v2283_v10 = vpop.f32.mrf.mxu2 }
 0x89f   : > { %2289 = vst [vmem:[%s378_s2 + $0x18] sm:$0xff] %v2283_v10 }
 0x8a0   : > { %3174 = shalt.err (!%p3171_p10)
}
 0x8a1   : > { %s3245_s10 = smov 128   ;;  %s3246_s14 = smov 8  }
 0x8a2   : > { %2763 = dma.vmem_to_hbm [thread:$0]  (%p3371_p3), %s2304_s16, 512, %s2306_s17, %s2291_s5, %s3245_s10, %s3245_s10, %s3246_s14  }
 0x8a3 PF: > { %p2798_p11 = scmp.ge.s32.totalorder %s3229_s24, 2  ;;  %s2320_s15 = sand.u32 1, %s3217_s21  }
 0x8a4   : > { %s2321_s27 = scalar_lea.sflag [#allocation4], %s2320_s15 }
 0x8a5   : > { %p2786_p12 = pnand %p2798_p11, %p3317_p6 }
 0x8a7   : > { %p2787_p13 = pneg %p2786_p12 }
 0x8a9   : > { %3212 = dma.done.wait (%p2787_p13), %s2321_s27, 512  }
 0x8aa   : > { %3214 = vsyncadd (%p2787_p13), %s2321_s27, 4294966784  ;;  %s4245_s9 = sld [smem:[#allocation20_spill]]  ;;  %p24_p0 = scmp.ge.s32.totalorder %s3358_s18, 6  }
 0x8ab   : > { %s4246_s21 = smov %s3221_s22  ;;  %s4247_s22 = smov %s3225_s23 }
 0x8ac   : > { %s4249_s24 = smov %s3358_s18  ;;  %26 = sbr.rel (!%p24_p0) target bundleno = 14 (0xe), region = 118 }
 0x8b0   : > { %s4248_s23 = smov %s4245_s9 }
 0x8b1   :  { %2327 = vsyncpa [#allocation3], 1 }
 0x8b2   :  { %2329 = vsyncpa [#allocation3 + $0x1], 1 }
 0x8b3   :  { %2330 = vsyncpa [#allocation6], 1 }
 0x8b4   :  { %2332 = vsyncpa [#allocation6 + $0x1], 1 }
 0x8b5   :  { %2333 = vsyncpa [#allocation9], 1 }
 0x8b6   :  { %2334 = vsyncpa [#allocation12], 1 }
 0x8b7   :  { %2335 = vsyncpa [#allocation4], 1 }
 0x8b8   :  { %2337 = vsyncpa [#allocation4 + $0x1], 1 }

</bundles_post_ra>
